<compile_context>
chip_gen: v7x
topology: tpu7x:2x2x1
jax: 0.10.0
libtpu: 0.0.40
codegen_flags: <defaults>
</compile_context>

<pallas_src>
import jax
import jax.numpy as jnp
from jax import lax
from jax.experimental import pallas as pl
from jax.experimental.pallas import tpu as pltpu

# ----- model dims (small, consistent with the module's __init__ args) -----
B = 8                          # batch
POOLED_DIM = 24                # pooled_node_emb feature dim
T_DIM = 8                      # T feature dim
HYPER_IN = POOLED_DIM + T_DIM  # hyper_input_dim = 32
OBS_DIM = 32                   # obs_dim
HIDDEN = 32                    # args.hidden_size (dynamic_hidden_dim)
ACTION_DIM = 16                # action_dim
HYPER_HIDDEN = 64              # trunk width of the hypernetwork

# ----- 128-lane-aligned generated-parameter layout -----
W1_OFF = 0
W1_LEN = OBS_DIM * HIDDEN              # 1024
W2_OFF = W1_OFF + W1_LEN               # 1024
W2_LEN = HIDDEN * HIDDEN               # 1024
W3_OFF = W2_OFF + W2_LEN               # 2048
W3_LEN = HIDDEN * ACTION_DIM           # 512
BIAS_OFF = W3_OFF + W3_LEN             # 2560
B1_OFF = BIAS_OFF                      # 2560 (width HIDDEN)
B2_OFF = BIAS_OFF + HIDDEN             # 2592 (width HIDDEN)
B3_OFF = BIAS_OFF + 2 * HIDDEN         # 2624 (width ACTION_DIM)
TOTAL_PAD = BIAS_OFF + 128             # 2688 = 21 * 128 (lane-aligned, padded)
OUT_LANES = 128                        # packed output slab width


# ----------------------------- fused kernel ---------------------------------
def _h_actor_kernel(gumbel_ref, x_ref, w0_ref, b0_ref, w1_ref, b1_ref,
                    wh_ref, bh_ref, obs_ref, out_ref, hyper_ref):
    # ---- hypernetwork trunk + weight-generating head (MXU, bf16 w / f32 acc) ----
    x = x_ref[...].astype(jnp.bfloat16)                               # (B, HYPER_IN)
    h = jnp.dot(x, w0_ref[...], preferred_element_type=jnp.float32) + b0_ref[...]
    h = jnp.maximum(h, 0.0)
    h = jnp.dot(h.astype(jnp.bfloat16), w1_ref[...],
                preferred_element_type=jnp.float32) + b1_ref[...]
    h = jnp.maximum(h, 0.0)
    hyper_ref[...] = (jnp.dot(h.astype(jnp.bfloat16), wh_ref[...],
                              preferred_element_type=jnp.float32)
                      + bh_ref[...])                                  # (B, TOTAL_PAD)

    # ---- per-sample dynamic MLP on the VPU (unrolled lane-slice accumulate) ----
    obs = obs_ref[...]                                                # (B, OBS_DIM) f32

    h1 = hyper_ref[:, B1_OFF:B1_OFF + HIDDEN]                         # (B, HIDDEN)
    for i in range(OBS_DIM):
        w_row = hyper_ref[:, W1_OFF + i * HIDDEN:W1_OFF + (i + 1) * HIDDEN]
        h1 = h1 + obs[:, i:i + 1] * w_row
    h1 = jnp.maximum(h1, 0.0)

    h2 = hyper_ref[:, B2_OFF:B2_OFF + HIDDEN]                         # (B, HIDDEN)
    for j in range(HIDDEN):
        w_row = hyper_ref[:, W2_OFF + j * HIDDEN:W2_OFF + (j + 1) * HIDDEN]
        h2 = h2 + h1[:, j:j + 1] * w_row
    h2 = jnp.maximum(h2, 0.0)

    logits = hyper_ref[:, B3_OFF:B3_OFF + ACTION_DIM]                 # (B, ACTION_DIM)
    for j in range(HIDDEN):
        w_row = hyper_ref[:, W3_OFF + j * ACTION_DIM:W3_OFF + (j + 1) * ACTION_DIM]
        logits = logits + h2[:, j:j + 1] * w_row

    # ---- log-softmax (== log of F.softmax(actor_features, dim=-1)) ----
    row_max = jnp.max(logits, axis=-1, keepdims=True)
    shifted = logits - row_max
    denom = jnp.sum(jnp.exp(shifted), axis=-1, keepdims=True)
    log_probs = shifted - jnp.log(denom)                              # (B, A)

    # ---- Categorical(probs).sample() via Gumbel-max (noise supplied as input) ----
    perturbed = logits + gumbel_ref[...]                              # (B, A)
    col = lax.broadcasted_iota(jnp.int32, (B, ACTION_DIM), 1)
    pmax = jnp.max(perturbed, axis=-1, keepdims=True)
    cand = jnp.where(perturbed == pmax, col, jnp.int32(ACTION_DIM))
    action = jnp.min(cand, axis=-1, keepdims=True)                    # (B, 1) int32
    sel_logp = jnp.sum(jnp.where(col == action, log_probs, 0.0),
                       axis=-1, keepdims=True)                        # (B, 1) f32

    # ---- pack (action, log_prob) into one lane-dense slab: unmasked store ----
    lane = lax.broadcasted_iota(jnp.int32, (B, OUT_LANES), 1)
    packed = jnp.where(lane == 0, action.astype(jnp.float32),
                       jnp.where(lane == 1, sel_logp, 0.0))
    out_ref[...] = packed


# ------------------------------- wrapper ------------------------------------
def init_params(key):
    ks = jax.random.split(key, 3)

    def dense(k, fan_in, fan_out, scale=1.0):
        w = (jax.random.normal(k, (fan_in, fan_out), jnp.float32)
             * (scale / jnp.sqrt(fan_in)))
        return w.astype(jnp.bfloat16)          # bf16 storage, f32 accumulation in-kernel

    return {
        'w0': dense(ks[0], HYPER_IN, HYPER_HIDDEN),
        'b0': jnp.zeros((1, HYPER_HIDDEN), jnp.float32),
        'w1': dense(ks[1], HYPER_HIDDEN, HYPER_HIDDEN),
        'b1': jnp.zeros((1, HYPER_HIDDEN), jnp.float32),
        # small head init, stands in for args.h_init ("head_init_method")
        'wh': dense(ks[2], HYPER_HIDDEN, TOTAL_PAD, scale=0.1),
        'bh': jnp.zeros((1, TOTAL_PAD), jnp.float32),
    }


@jax.jit
def h_actor_forward(params, pooled_node_emb, T, obs, sample_key):
    """Returns (actions[B,1] int32, action_log_probs[B,1] f32)."""
    hyper_input = jnp.concatenate([pooled_node_emb, T], axis=-1)      # (B, HYPER_IN)
    # Gumbel noise generated outside the kernel (TPU stateful PRNG is not
    # available under interpret mode); tiny (B, A) f32 input, one extra DMA.
    gumbel = jax.random.gumbel(sample_key, (B, ACTION_DIM), dtype=jnp.float32)

    vmem = pl.BlockSpec(memory_space=pltpu.MemorySpace.VMEM)

    packed = pl.pallas_call(
        _h_actor_kernel,
        out_shape=jax.ShapeDtypeStruct((B, OUT_LANES), jnp.float32),
        in_specs=[vmem] * 9,
        out_specs=vmem,
        scratch_shapes=[pltpu.VMEM((B, TOTAL_PAD), jnp.float32)],
    )(gumbel, hyper_input, params['w0'], params['b0'], params['w1'],
      params['b1'], params['wh'], params['bh'], obs)

    actions = packed[:, 0:1].astype(jnp.int32)
    action_log_probs = packed[:, 1:2]
    return actions, action_log_probs


if __name__ == "__main__":
    key = jax.random.PRNGKey(0)
    pkey, k1, k2, k3, ksample = jax.random.split(key, 5)

    params = init_params(pkey)
    pooled_node_emb = jax.random.normal(k1, (B, POOLED_DIM), jnp.float32)
    T = jax.random.normal(k2, (B, T_DIM), jnp.float32)
    obs = jax.random.normal(k3, (B, OBS_DIM), jnp.float32)

    actions, action_log_probs = h_actor_forward(params, pooled_node_emb, T, obs, ksample)
    jax.block_until_ready((actions, action_log_probs))

    assert actions.shape == (B, 1) and actions.dtype == jnp.int32
    assert action_log_probs.shape == (B, 1) and action_log_probs.dtype == jnp.float32
    assert bool(jnp.all((actions >= 0) & (actions < ACTION_DIM)))
    assert bool(jnp.all(jnp.isfinite(action_log_probs)))
    assert bool(jnp.all(action_log_probs <= 1e-6))
    print("KERNEL_OK")
</pallas_src>

<mosaic_0001>
module attributes {stable_mosaic.version = 11 : i64} {
  func.func @_h_actor_kernel(%arg0: memref<8x16xf32, #tpu.memory_space<vmem>>, %arg1: memref<8x32xf32, #tpu.memory_space<vmem>>, %arg2: memref<32x64xbf16, #tpu.memory_space<vmem>>, %arg3: memref<1x64xf32, #tpu.memory_space<vmem>>, %arg4: memref<64x64xbf16, #tpu.memory_space<vmem>>, %arg5: memref<1x64xf32, #tpu.memory_space<vmem>>, %arg6: memref<64x2688xbf16, #tpu.memory_space<vmem>>, %arg7: memref<1x2688xf32, #tpu.memory_space<vmem>>, %arg8: memref<8x32xf32, #tpu.memory_space<vmem>>, %arg9: memref<8x128xf32, #tpu.memory_space<vmem>>, %arg10: memref<8x2688xf32, #tpu.memory_space<vmem>>) attributes {dimension_semantics = [], scalar_prefetch = 0 : i64, scratch_operands = 1 : i64, tpu.core_type = #tpu.core_type<tc>} {
    %c0 = arith.constant 0 : index
    %c0_0 = arith.constant 0 : index
    %0 = vector.load %arg1[%c0, %c0_0] : memref<8x32xf32, #tpu.memory_space<vmem>>, vector<8x32xf32>
    %1 = arith.truncf %0 : vector<8x32xf32> to vector<8x32xbf16>
    %c0_1 = arith.constant 0 : index
    %c0_2 = arith.constant 0 : index
    %2 = vector.load %arg2[%c0_1, %c0_2] : memref<32x64xbf16, #tpu.memory_space<vmem>>, vector<32x64xbf16>
    %cst = arith.constant dense<0.000000e+00> : vector<8x64xf32>
    %3 = tpu.matmul %1, %2, %cst {dimension_numbers = #tpu.dot_dimension_numbers<[1], [0], [0], [1], [0, 0, 1, 1], [], []>} : vector<8x32xbf16>, vector<32x64xbf16>, vector<8x64xf32> -> vector<8x64xf32>
    %c0_3 = arith.constant 0 : index
    %c0_4 = arith.constant 0 : index
    %4 = vector.load %arg3[%c0_3, %c0_4] : memref<1x64xf32, #tpu.memory_space<vmem>>, vector<1x64xf32>
    %5 = vector.broadcast %4 : vector<1x64xf32> to vector<8x64xf32>
    %6 = arith.addf %3, %5 : vector<8x64xf32>
    %cst_5 = arith.constant 0.000000e+00 : f32
    %7 = vector.broadcast %cst_5 : f32 to vector<8x64xf32>
    %8 = arith.maximumf %6, %7 : vector<8x64xf32>
    %9 = arith.truncf %8 : vector<8x64xf32> to vector<8x64xbf16>
    %c0_6 = arith.constant 0 : index
    %c0_7 = arith.constant 0 : index
    %10 = vector.load %arg4[%c0_6, %c0_7] : memref<64x64xbf16, #tpu.memory_space<vmem>>, vector<64x64xbf16>
    %cst_8 = arith.constant dense<0.000000e+00> : vector<8x64xf32>
    %11 = tpu.matmul %9, %10, %cst_8 {dimension_numbers = #tpu.dot_dimension_numbers<[1], [0], [0], [1], [0, 0, 1, 1], [], []>} : vector<8x64xbf16>, vector<64x64xbf16>, vector<8x64xf32> -> vector<8x64xf32>
    %c0_9 = arith.constant 0 : index
    %c0_10 = arith.constant 0 : index
    %12 = vector.load %arg5[%c0_9, %c0_10] : memref<1x64xf32, #tpu.memory_space<vmem>>, vector<1x64xf32>
    %13 = vector.broadcast %12 : vector<1x64xf32> to vector<8x64xf32>
    %14 = arith.addf %11, %13 : vector<8x64xf32>
    %cst_11 = arith.constant 0.000000e+00 : f32
    %15 = vector.broadcast %cst_11 : f32 to vector<8x64xf32>
    %16 = arith.maximumf %14, %15 : vector<8x64xf32>
    %17 = arith.truncf %16 : vector<8x64xf32> to vector<8x64xbf16>
    %c0_12 = arith.constant 0 : index
    %c0_13 = arith.constant 0 : index
    %18 = vector.load %arg6[%c0_12, %c0_13] : memref<64x2688xbf16, #tpu.memory_space<vmem>>, vector<64x2688xbf16>
    %cst_14 = arith.constant dense<0.000000e+00> : vector<8x2688xf32>
    %19 = tpu.matmul %17, %18, %cst_14 {dimension_numbers = #tpu.dot_dimension_numbers<[1], [0], [0], [1], [0, 0, 1, 1], [], []>} : vector<8x64xbf16>, vector<64x2688xbf16>, vector<8x2688xf32> -> vector<8x2688xf32>
    %c0_15 = arith.constant 0 : index
    %c0_16 = arith.constant 0 : index
    %20 = vector.load %arg7[%c0_15, %c0_16] : memref<1x2688xf32, #tpu.memory_space<vmem>>, vector<1x2688xf32>
    %21 = vector.broadcast %20 : vector<1x2688xf32> to vector<8x2688xf32>
    %22 = arith.addf %19, %21 : vector<8x2688xf32>
    %c0_17 = arith.constant 0 : index
    %c0_18 = arith.constant 0 : index
    %23 = vector.load %arg10[%c0_17, %c0_18] : memref<8x2688xf32, #tpu.memory_space<vmem>>, vector<8x2688xf32>
    tpu.vector_store %arg10[%c0_17, %c0_18], %22 {strides = array<i32>} : memref<8x2688xf32, #tpu.memory_space<vmem>>, vector<8x2688xf32>,
    %c0_19 = arith.constant 0 : index
    %c0_20 = arith.constant 0 : index
    %24 = vector.load %arg8[%c0_19, %c0_20] : memref<8x32xf32, #tpu.memory_space<vmem>>, vector<8x32xf32>
    %c0_21 = arith.constant 0 : index
    %c2560 = arith.constant 2560 : index
    %25 = vector.load %arg10[%c0_21, %c2560] : memref<8x2688xf32, #tpu.memory_space<vmem>>, vector<8x32xf32>
    %c0_22 = arith.constant 0 : index
    %c0_23 = arith.constant 0 : index
    %26 = vector.load %arg10[%c0_22, %c0_23] : memref<8x2688xf32, #tpu.memory_space<vmem>>, vector<8x32xf32>
    %27 = vector.extract_strided_slice %24 {offsets = [0, 0], sizes = [8, 1], strides = [1, 1]} : vector<8x32xf32> to vector<8x1xf32>
    %28 = vector.broadcast %27 : vector<8x1xf32> to vector<8x32xf32>
    %29 = arith.mulf %28, %26 : vector<8x32xf32>
    %30 = arith.addf %25, %29 : vector<8x32xf32>
    %c0_24 = arith.constant 0 : index
    %c32 = arith.constant 32 : index
    %31 = vector.load %arg10[%c0_24, %c32] : memref<8x2688xf32, #tpu.memory_space<vmem>>, vector<8x32xf32>
    %32 = vector.extract_strided_slice %24 {offsets = [0, 1], sizes = [8, 1], strides = [1, 1]} : vector<8x32xf32> to vector<8x1xf32>
    %33 = vector.broadcast %32 : vector<8x1xf32> to vector<8x32xf32>
    %34 = arith.mulf %33, %31 : vector<8x32xf32>
    %35 = arith.addf %30, %34 : vector<8x32xf32>
    %c0_25 = arith.constant 0 : index
    %c64 = arith.constant 64 : index
    %36 = vector.load %arg10[%c0_25, %c64] : memref<8x2688xf32, #tpu.memory_space<vmem>>, vector<8x32xf32>
    %37 = vector.extract_strided_slice %24 {offsets = [0, 2], sizes = [8, 1], strides = [1, 1]} : vector<8x32xf32> to vector<8x1xf32>
    %38 = vector.broadcast %37 : vector<8x1xf32> to vector<8x32xf32>
    %39 = arith.mulf %38, %36 : vector<8x32xf32>
    %40 = arith.addf %35, %39 : vector<8x32xf32>
    %c0_26 = arith.constant 0 : index
    %c96 = arith.constant 96 : index
    %41 = vector.load %arg10[%c0_26, %c96] : memref<8x2688xf32, #tpu.memory_space<vmem>>, vector<8x32xf32>
    %42 = vector.extract_strided_slice %24 {offsets = [0, 3], sizes = [8, 1], strides = [1, 1]} : vector<8x32xf32> to vector<8x1xf32>
    %43 = vector.broadcast %42 : vector<8x1xf32> to vector<8x32xf32>
    %44 = arith.mulf %43, %41 : vector<8x32xf32>
    %45 = arith.addf %40, %44 : vector<8x32xf32>
    %c0_27 = arith.constant 0 : index
    %c128 = arith.constant 128 : index
    %46 = vector.load %arg10[%c0_27, %c128] : memref<8x2688xf32, #tpu.memory_space<vmem>>, vector<8x32xf32>
    %47 = vector.extract_strided_slice %24 {offsets = [0, 4], sizes = [8, 1], strides = [1, 1]} : vector<8x32xf32> to vector<8x1xf32>
    %48 = vector.broadcast %47 : vector<8x1xf32> to vector<8x32xf32>
    %49 = arith.mulf %48, %46 : vector<8x32xf32>
    %50 = arith.addf %45, %49 : vector<8x32xf32>
    %c0_28 = arith.constant 0 : index
    %c160 = arith.constant 160 : index
    %51 = vector.load %arg10[%c0_28, %c160] : memref<8x2688xf32, #tpu.memory_space<vmem>>, vector<8x32xf32>
    %52 = vector.extract_strided_slice %24 {offsets = [0, 5], sizes = [8, 1], strides = [1, 1]} : vector<8x32xf32> to vector<8x1xf32>
    %53 = vector.broadcast %52 : vector<8x1xf32> to vector<8x32xf32>
    %54 = arith.mulf %53, %51 : vector<8x32xf32>
    %55 = arith.addf %50, %54 : vector<8x32xf32>
    %c0_29 = arith.constant 0 : index
    %c192 = arith.constant 192 : index
    %56 = vector.load %arg10[%c0_29, %c192] : memref<8x2688xf32, #tpu.memory_space<vmem>>, vector<8x32xf32>
    %57 = vector.extract_strided_slice %24 {offsets = [0, 6], sizes = [8, 1], strides = [1, 1]} : vector<8x32xf32> to vector<8x1xf32>
    %58 = vector.broadcast %57 : vector<8x1xf32> to vector<8x32xf32>
    %59 = arith.mulf %58, %56 : vector<8x32xf32>
    %60 = arith.addf %55, %59 : vector<8x32xf32>
    %c0_30 = arith.constant 0 : index
    %c224 = arith.constant 224 : index
    %61 = vector.load %arg10[%c0_30, %c224] : memref<8x2688xf32, #tpu.memory_space<vmem>>, vector<8x32xf32>
    %62 = vector.extract_strided_slice %24 {offsets = [0, 7], sizes = [8, 1], strides = [1, 1]} : vector<8x32xf32> to vector<8x1xf32>
    %63 = vector.broadcast %62 : vector<8x1xf32> to vector<8x32xf32>
    %64 = arith.mulf %63, %61 : vector<8x32xf32>
    %65 = arith.addf %60, %64 : vector<8x32xf32>
    %c0_31 = arith.constant 0 : index
    %c256 = arith.constant 256 : index
    %66 = vector.load %arg10[%c0_31, %c256] : memref<8x2688xf32, #tpu.memory_space<vmem>>, vector<8x32xf32>
    %67 = vector.extract_strided_slice %24 {offsets = [0, 8], sizes = [8, 1], strides = [1, 1]} : vector<8x32xf32> to vector<8x1xf32>
    %68 = vector.broadcast %67 : vector<8x1xf32> to vector<8x32xf32>
    %69 = arith.mulf %68, %66 : vector<8x32xf32>
    %70 = arith.addf %65, %69 : vector<8x32xf32>
    %c0_32 = arith.constant 0 : index
    %c288 = arith.constant 288 : index
    %71 = vector.load %arg10[%c0_32, %c288] : memref<8x2688xf32, #tpu.memory_space<vmem>>, vector<8x32xf32>
    %72 = vector.extract_strided_slice %24 {offsets = [0, 9], sizes = [8, 1], strides = [1, 1]} : vector<8x32xf32> to vector<8x1xf32>
    %73 = vector.broadcast %72 : vector<8x1xf32> to vector<8x32xf32>
    %74 = arith.mulf %73, %71 : vector<8x32xf32>
    %75 = arith.addf %70, %74 : vector<8x32xf32>
    %c0_33 = arith.constant 0 : index
    %c320 = arith.constant 320 : index
    %76 = vector.load %arg10[%c0_33, %c320] : memref<8x2688xf32, #tpu.memory_space<vmem>>, vector<8x32xf32>
    %77 = vector.extract_strided_slice %24 {offsets = [0, 10], sizes = [8, 1], strides = [1, 1]} : vector<8x32xf32> to vector<8x1xf32>
    %78 = vector.broadcast %77 : vector<8x1xf32> to vector<8x32xf32>
    %79 = arith.mulf %78, %76 : vector<8x32xf32>
    %80 = arith.addf %75, %79 : vector<8x32xf32>
    %c0_34 = arith.constant 0 : index
    %c352 = arith.constant 352 : index
    %81 = vector.load %arg10[%c0_34, %c352] : memref<8x2688xf32, #tpu.memory_space<vmem>>, vector<8x32xf32>
    %82 = vector.extract_strided_slice %24 {offsets = [0, 11], sizes = [8, 1], strides = [1, 1]} : vector<8x32xf32> to vector<8x1xf32>
    %83 = vector.broadcast %82 : vector<8x1xf32> to vector<8x32xf32>
    %84 = arith.mulf %83, %81 : vector<8x32xf32>
    %85 = arith.addf %80, %84 : vector<8x32xf32>
    %c0_35 = arith.constant 0 : index
    %c384 = arith.constant 384 : index
    %86 = vector.load %arg10[%c0_35, %c384] : memref<8x2688xf32, #tpu.memory_space<vmem>>, vector<8x32xf32>
    %87 = vector.extract_strided_slice %24 {offsets = [0, 12], sizes = [8, 1], strides = [1, 1]} : vector<8x32xf32> to vector<8x1xf32>
    %88 = vector.broadcast %87 : vector<8x1xf32> to vector<8x32xf32>
    %89 = arith.mulf %88, %86 : vector<8x32xf32>
    %90 = arith.addf %85, %89 : vector<8x32xf32>
    %c0_36 = arith.constant 0 : index
    %c416 = arith.constant 416 : index
    %91 = vector.load %arg10[%c0_36, %c416] : memref<8x2688xf32, #tpu.memory_space<vmem>>, vector<8x32xf32>
    %92 = vector.extract_strided_slice %24 {offsets = [0, 13], sizes = [8, 1], strides = [1, 1]} : vector<8x32xf32> to vector<8x1xf32>
    %93 = vector.broadcast %92 : vector<8x1xf32> to vector<8x32xf32>
    %94 = arith.mulf %93, %91 : vector<8x32xf32>
    %95 = arith.addf %90, %94 : vector<8x32xf32>
    %c0_37 = arith.constant 0 : index
    %c448 = arith.constant 448 : index
    %96 = vector.load %arg10[%c0_37, %c448] : memref<8x2688xf32, #tpu.memory_space<vmem>>, vector<8x32xf32>
    %97 = vector.extract_strided_slice %24 {offsets = [0, 14], sizes = [8, 1], strides = [1, 1]} : vector<8x32xf32> to vector<8x1xf32>
    %98 = vector.broadcast %97 : vector<8x1xf32> to vector<8x32xf32>
    %99 = arith.mulf %98, %96 : vector<8x32xf32>
    %100 = arith.addf %95, %99 : vector<8x32xf32>
    %c0_38 = arith.constant 0 : index
    %c480 = arith.constant 480 : index
    %101 = vector.load %arg10[%c0_38, %c480] : memref<8x2688xf32, #tpu.memory_space<vmem>>, vector<8x32xf32>
    %102 = vector.extract_strided_slice %24 {offsets = [0, 15], sizes = [8, 1], strides = [1, 1]} : vector<8x32xf32> to vector<8x1xf32>
    %103 = vector.broadcast %102 : vector<8x1xf32> to vector<8x32xf32>
    %104 = arith.mulf %103, %101 : vector<8x32xf32>
    %105 = arith.addf %100, %104 : vector<8x32xf32>
    %c0_39 = arith.constant 0 : index
    %c512 = arith.constant 512 : index
    %106 = vector.load %arg10[%c0_39, %c512] : memref<8x2688xf32, #tpu.memory_space<vmem>>, vector<8x32xf32>
    %107 = vector.extract_strided_slice %24 {offsets = [0, 16], sizes = [8, 1], strides = [1, 1]} : vector<8x32xf32> to vector<8x1xf32>
    %108 = vector.broadcast %107 : vector<8x1xf32> to vector<8x32xf32>
    %109 = arith.mulf %108, %106 : vector<8x32xf32>
    %110 = arith.addf %105, %109 : vector<8x32xf32>
    %c0_40 = arith.constant 0 : index
    %c544 = arith.constant 544 : index
    %111 = vector.load %arg10[%c0_40, %c544] : memref<8x2688xf32, #tpu.memory_space<vmem>>, vector<8x32xf32>
    %112 = vector.extract_strided_slice %24 {offsets = [0, 17], sizes = [8, 1], strides = [1, 1]} : vector<8x32xf32> to vector<8x1xf32>
    %113 = vector.broadcast %112 : vector<8x1xf32> to vector<8x32xf32>
    %114 = arith.mulf %113, %111 : vector<8x32xf32>
    %115 = arith.addf %110, %114 : vector<8x32xf32>
    %c0_41 = arith.constant 0 : index
    %c576 = arith.constant 576 : index
    %116 = vector.load %arg10[%c0_41, %c576] : memref<8x2688xf32, #tpu.memory_space<vmem>>, vector<8x32xf32>
    %117 = vector.extract_strided_slice %24 {offsets = [0, 18], sizes = [8, 1], strides = [1, 1]} : vector<8x32xf32> to vector<8x1xf32>
    %118 = vector.broadcast %117 : vector<8x1xf32> to vector<8x32xf32>
    %119 = arith.mulf %118, %116 : vector<8x32xf32>
    %120 = arith.addf %115, %119 : vector<8x32xf32>
    %c0_42 = arith.constant 0 : index
    %c608 = arith.constant 608 : index
    %121 = vector.load %arg10[%c0_42, %c608] : memref<8x2688xf32, #tpu.memory_space<vmem>>, vector<8x32xf32>
    %122 = vector.extract_strided_slice %24 {offsets = [0, 19], sizes = [8, 1], strides = [1, 1]} : vector<8x32xf32> to vector<8x1xf32>
    %123 = vector.broadcast %122 : vector<8x1xf32> to vector<8x32xf32>
    %124 = arith.mulf %123, %121 : vector<8x32xf32>
    %125 = arith.addf %120, %124 : vector<8x32xf32>
    %c0_43 = arith.constant 0 : index
    %c640 = arith.constant 640 : index
    %126 = vector.load %arg10[%c0_43, %c640] : memref<8x2688xf32, #tpu.memory_space<vmem>>, vector<8x32xf32>
    %127 = vector.extract_strided_slice %24 {offsets = [0, 20], sizes = [8, 1], strides = [1, 1]} : vector<8x32xf32> to vector<8x1xf32>
    %128 = vector.broadcast %127 : vector<8x1xf32> to vector<8x32xf32>
    %129 = arith.mulf %128, %126 : vector<8x32xf32>
    %130 = arith.addf %125, %129 : vector<8x32xf32>
    %c0_44 = arith.constant 0 : index
    %c672 = arith.constant 672 : index
    %131 = vector.load %arg10[%c0_44, %c672] : memref<8x2688xf32, #tpu.memory_space<vmem>>, vector<8x32xf32>
    %132 = vector.extract_strided_slice %24 {offsets = [0, 21], sizes = [8, 1], strides = [1, 1]} : vector<8x32xf32> to vector<8x1xf32>
    %133 = vector.broadcast %132 : vector<8x1xf32> to vector<8x32xf32>
    %134 = arith.mulf %133, %131 : vector<8x32xf32>
    %135 = arith.addf %130, %134 : vector<8x32xf32>
    %c0_45 = arith.constant 0 : index
    %c704 = arith.constant 704 : index
    %136 = vector.load %arg10[%c0_45, %c704] : memref<8x2688xf32, #tpu.memory_space<vmem>>, vector<8x32xf32>
    %137 = vector.extract_strided_slice %24 {offsets = [0, 22], sizes = [8, 1], strides = [1, 1]} : vector<8x32xf32> to vector<8x1xf32>
    %138 = vector.broadcast %137 : vector<8x1xf32> to vector<8x32xf32>
    %139 = arith.mulf %138, %136 : vector<8x32xf32>
    %140 = arith.addf %135, %139 : vector<8x32xf32>
    %c0_46 = arith.constant 0 : index
    %c736 = arith.constant 736 : index
    %141 = vector.load %arg10[%c0_46, %c736] : memref<8x2688xf32, #tpu.memory_space<vmem>>, vector<8x32xf32>
    %142 = vector.extract_strided_slice %24 {offsets = [0, 23], sizes = [8, 1], strides = [1, 1]} : vector<8x32xf32> to vector<8x1xf32>
    %143 = vector.broadcast %142 : vector<8x1xf32> to vector<8x32xf32>
    %144 = arith.mulf %143, %141 : vector<8x32xf32>
    %145 = arith.addf %140, %144 : vector<8x32xf32>
    %c0_47 = arith.constant 0 : index
    %c768 = arith.constant 768 : index
    %146 = vector.load %arg10[%c0_47, %c768] : memref<8x2688xf32, #tpu.memory_space<vmem>>, vector<8x32xf32>
    %147 = vector.extract_strided_slice %24 {offsets = [0, 24], sizes = [8, 1], strides = [1, 1]} : vector<8x32xf32> to vector<8x1xf32>
    %148 = vector.broadcast %147 : vector<8x1xf32> to vector<8x32xf32>
    %149 = arith.mulf %148, %146 : vector<8x32xf32>
    %150 = arith.addf %145, %149 : vector<8x32xf32>
    %c0_48 = arith.constant 0 : index
    %c800 = arith.constant 800 : index
    %151 = vector.load %arg10[%c0_48, %c800] : memref<8x2688xf32, #tpu.memory_space<vmem>>, vector<8x32xf32>
    %152 = vector.extract_strided_slice %24 {offsets = [0, 25], sizes = [8, 1], strides = [1, 1]} : vector<8x32xf32> to vector<8x1xf32>
    %153 = vector.broadcast %152 : vector<8x1xf32> to vector<8x32xf32>
    %154 = arith.mulf %153, %151 : vector<8x32xf32>
    %155 = arith.addf %150, %154 : vector<8x32xf32>
    %c0_49 = arith.constant 0 : index
    %c832 = arith.constant 832 : index
    %156 = vector.load %arg10[%c0_49, %c832] : memref<8x2688xf32, #tpu.memory_space<vmem>>, vector<8x32xf32>
    %157 = vector.extract_strided_slice %24 {offsets = [0, 26], sizes = [8, 1], strides = [1, 1]} : vector<8x32xf32> to vector<8x1xf32>
    %158 = vector.broadcast %157 : vector<8x1xf32> to vector<8x32xf32>
    %159 = arith.mulf %158, %156 : vector<8x32xf32>
    %160 = arith.addf %155, %159 : vector<8x32xf32>
    %c0_50 = arith.constant 0 : index
    %c864 = arith.constant 864 : index
    %161 = vector.load %arg10[%c0_50, %c864] : memref<8x2688xf32, #tpu.memory_space<vmem>>, vector<8x32xf32>
    %162 = vector.extract_strided_slice %24 {offsets = [0, 27], sizes = [8, 1], strides = [1, 1]} : vector<8x32xf32> to vector<8x1xf32>
    %163 = vector.broadcast %162 : vector<8x1xf32> to vector<8x32xf32>
    %164 = arith.mulf %163, %161 : vector<8x32xf32>
    %165 = arith.addf %160, %164 : vector<8x32xf32>
    %c0_51 = arith.constant 0 : index
    %c896 = arith.constant 896 : index
    %166 = vector.load %arg10[%c0_51, %c896] : memref<8x2688xf32, #tpu.memory_space<vmem>>, vector<8x32xf32>
    %167 = vector.extract_strided_slice %24 {offsets = [0, 28], sizes = [8, 1], strides = [1, 1]} : vector<8x32xf32> to vector<8x1xf32>
    %168 = vector.broadcast %167 : vector<8x1xf32> to vector<8x32xf32>
    %169 = arith.mulf %168, %166 : vector<8x32xf32>
    %170 = arith.addf %165, %169 : vector<8x32xf32>
    %c0_52 = arith.constant 0 : index
    %c928 = arith.constant 928 : index
    %171 = vector.load %arg10[%c0_52, %c928] : memref<8x2688xf32, #tpu.memory_space<vmem>>, vector<8x32xf32>
    %172 = vector.extract_strided_slice %24 {offsets = [0, 29], sizes = [8, 1], strides = [1, 1]} : vector<8x32xf32> to vector<8x1xf32>
    %173 = vector.broadcast %172 : vector<8x1xf32> to vector<8x32xf32>
    %174 = arith.mulf %173, %171 : vector<8x32xf32>
    %175 = arith.addf %170, %174 : vector<8x32xf32>
    %c0_53 = arith.constant 0 : index
    %c960 = arith.constant 960 : index
    %176 = vector.load %arg10[%c0_53, %c960] : memref<8x2688xf32, #tpu.memory_space<vmem>>, vector<8x32xf32>
    %177 = vector.extract_strided_slice %24 {offsets = [0, 30], sizes = [8, 1], strides = [1, 1]} : vector<8x32xf32> to vector<8x1xf32>
    %178 = vector.broadcast %177 : vector<8x1xf32> to vector<8x32xf32>
    %179 = arith.mulf %178, %176 : vector<8x32xf32>
    %180 = arith.addf %175, %179 : vector<8x32xf32>
    %c0_54 = arith.constant 0 : index
    %c992 = arith.constant 992 : index
    %181 = vector.load %arg10[%c0_54, %c992] : memref<8x2688xf32, #tpu.memory_space<vmem>>, vector<8x32xf32>
    %182 = vector.extract_strided_slice %24 {offsets = [0, 31], sizes = [8, 1], strides = [1, 1]} : vector<8x32xf32> to vector<8x1xf32>
    %183 = vector.broadcast %182 : vector<8x1xf32> to vector<8x32xf32>
    %184 = arith.mulf %183, %181 : vector<8x32xf32>
    %185 = arith.addf %180, %184 : vector<8x32xf32>
    %cst_55 = arith.constant 0.000000e+00 : f32
    %186 = vector.broadcast %cst_55 : f32 to vector<8x32xf32>
    %187 = arith.maximumf %185, %186 : vector<8x32xf32>
    %c0_56 = arith.constant 0 : index
    %c2592 = arith.constant 2592 : index
    %188 = vector.load %arg10[%c0_56, %c2592] : memref<8x2688xf32, #tpu.memory_space<vmem>>, vector<8x32xf32>
    %c0_57 = arith.constant 0 : index
    %c1024 = arith.constant 1024 : index
    %189 = vector.load %arg10[%c0_57, %c1024] : memref<8x2688xf32, #tpu.memory_space<vmem>>, vector<8x32xf32>
    %190 = vector.extract_strided_slice %187 {offsets = [0, 0], sizes = [8, 1], strides = [1, 1]} : vector<8x32xf32> to vector<8x1xf32>
    %191 = vector.broadcast %190 : vector<8x1xf32> to vector<8x32xf32>
    %192 = arith.mulf %191, %189 : vector<8x32xf32>
    %193 = arith.addf %188, %192 : vector<8x32xf32>
    %c0_58 = arith.constant 0 : index
    %c1056 = arith.constant 1056 : index
    %194 = vector.load %arg10[%c0_58, %c1056] : memref<8x2688xf32, #tpu.memory_space<vmem>>, vector<8x32xf32>
    %195 = vector.extract_strided_slice %187 {offsets = [0, 1], sizes = [8, 1], strides = [1, 1]} : vector<8x32xf32> to vector<8x1xf32>
    %196 = vector.broadcast %195 : vector<8x1xf32> to vector<8x32xf32>
    %197 = arith.mulf %196, %194 : vector<8x32xf32>
    %198 = arith.addf %193, %197 : vector<8x32xf32>
    %c0_59 = arith.constant 0 : index
    %c1088 = arith.constant 1088 : index
    %199 = vector.load %arg10[%c0_59, %c1088] : memref<8x2688xf32, #tpu.memory_space<vmem>>, vector<8x32xf32>
    %200 = vector.extract_strided_slice %187 {offsets = [0, 2], sizes = [8, 1], strides = [1, 1]} : vector<8x32xf32> to vector<8x1xf32>
    %201 = vector.broadcast %200 : vector<8x1xf32> to vector<8x32xf32>
    %202 = arith.mulf %201, %199 : vector<8x32xf32>
    %203 = arith.addf %198, %202 : vector<8x32xf32>
    %c0_60 = arith.constant 0 : index
    %c1120 = arith.constant 1120 : index
    %204 = vector.load %arg10[%c0_60, %c1120] : memref<8x2688xf32, #tpu.memory_space<vmem>>, vector<8x32xf32>
    %205 = vector.extract_strided_slice %187 {offsets = [0, 3], sizes = [8, 1], strides = [1, 1]} : vector<8x32xf32> to vector<8x1xf32>
    %206 = vector.broadcast %205 : vector<8x1xf32> to vector<8x32xf32>
    %207 = arith.mulf %206, %204 : vector<8x32xf32>
    %208 = arith.addf %203, %207 : vector<8x32xf32>
    %c0_61 = arith.constant 0 : index
    %c1152 = arith.constant 1152 : index
    %209 = vector.load %arg10[%c0_61, %c1152] : memref<8x2688xf32, #tpu.memory_space<vmem>>, vector<8x32xf32>
    %210 = vector.extract_strided_slice %187 {offsets = [0, 4], sizes = [8, 1], strides = [1, 1]} : vector<8x32xf32> to vector<8x1xf32>
    %211 = vector.broadcast %210 : vector<8x1xf32> to vector<8x32xf32>
    %212 = arith.mulf %211, %209 : vector<8x32xf32>
    %213 = arith.addf %208, %212 : vector<8x32xf32>
    %c0_62 = arith.constant 0 : index
    %c1184 = arith.constant 1184 : index
    %214 = vector.load %arg10[%c0_62, %c1184] : memref<8x2688xf32, #tpu.memory_space<vmem>>, vector<8x32xf32>
    %215 = vector.extract_strided_slice %187 {offsets = [0, 5], sizes = [8, 1], strides = [1, 1]} : vector<8x32xf32> to vector<8x1xf32>
    %216 = vector.broadcast %215 : vector<8x1xf32> to vector<8x32xf32>
    %217 = arith.mulf %216, %214 : vector<8x32xf32>
    %218 = arith.addf %213, %217 : vector<8x32xf32>
    %c0_63 = arith.constant 0 : index
    %c1216 = arith.constant 1216 : index
    %219 = vector.load %arg10[%c0_63, %c1216] : memref<8x2688xf32, #tpu.memory_space<vmem>>, vector<8x32xf32>
    %220 = vector.extract_strided_slice %187 {offsets = [0, 6], sizes = [8, 1], strides = [1, 1]} : vector<8x32xf32> to vector<8x1xf32>
    %221 = vector.broadcast %220 : vector<8x1xf32> to vector<8x32xf32>
    %222 = arith.mulf %221, %219 : vector<8x32xf32>
    %223 = arith.addf %218, %222 : vector<8x32xf32>
    %c0_64 = arith.constant 0 : index
    %c1248 = arith.constant 1248 : index
    %224 = vector.load %arg10[%c0_64, %c1248] : memref<8x2688xf32, #tpu.memory_space<vmem>>, vector<8x32xf32>
    %225 = vector.extract_strided_slice %187 {offsets = [0, 7], sizes = [8, 1], strides = [1, 1]} : vector<8x32xf32> to vector<8x1xf32>
    %226 = vector.broadcast %225 : vector<8x1xf32> to vector<8x32xf32>
    %227 = arith.mulf %226, %224 : vector<8x32xf32>
    %228 = arith.addf %223, %227 : vector<8x32xf32>
    %c0_65 = arith.constant 0 : index
    %c1280 = arith.constant 1280 : index
    %229 = vector.load %arg10[%c0_65, %c1280] : memref<8x2688xf32, #tpu.memory_space<vmem>>, vector<8x32xf32>
    %230 = vector.extract_strided_slice %187 {offsets = [0, 8], sizes = [8, 1], strides = [1, 1]} : vector<8x32xf32> to vector<8x1xf32>
    %231 = vector.broadcast %230 : vector<8x1xf32> to vector<8x32xf32>
    %232 = arith.mulf %231, %229 : vector<8x32xf32>
    %233 = arith.addf %228, %232 : vector<8x32xf32>
    %c0_66 = arith.constant 0 : index
    %c1312 = arith.constant 1312 : index
    %234 = vector.load %arg10[%c0_66, %c1312] : memref<8x2688xf32, #tpu.memory_space<vmem>>, vector<8x32xf32>
    %235 = vector.extract_strided_slice %187 {offsets = [0, 9], sizes = [8, 1], strides = [1, 1]} : vector<8x32xf32> to vector<8x1xf32>
    %236 = vector.broadcast %235 : vector<8x1xf32> to vector<8x32xf32>
    %237 = arith.mulf %236, %234 : vector<8x32xf32>
    %238 = arith.addf %233, %237 : vector<8x32xf32>
    %c0_67 = arith.constant 0 : index
    %c1344 = arith.constant 1344 : index
    %239 = vector.load %arg10[%c0_67, %c1344] : memref<8x2688xf32, #tpu.memory_space<vmem>>, vector<8x32xf32>
    %240 = vector.extract_strided_slice %187 {offsets = [0, 10], sizes = [8, 1], strides = [1, 1]} : vector<8x32xf32> to vector<8x1xf32>
    %241 = vector.broadcast %240 : vector<8x1xf32> to vector<8x32xf32>
    %242 = arith.mulf %241, %239 : vector<8x32xf32>
    %243 = arith.addf %238, %242 : vector<8x32xf32>
    %c0_68 = arith.constant 0 : index
    %c1376 = arith.constant 1376 : index
    %244 = vector.load %arg10[%c0_68, %c1376] : memref<8x2688xf32, #tpu.memory_space<vmem>>, vector<8x32xf32>
    %245 = vector.extract_strided_slice %187 {offsets = [0, 11], sizes = [8, 1], strides = [1, 1]} : vector<8x32xf32> to vector<8x1xf32>
    %246 = vector.broadcast %245 : vector<8x1xf32> to vector<8x32xf32>
    %247 = arith.mulf %246, %244 : vector<8x32xf32>
    %248 = arith.addf %243, %247 : vector<8x32xf32>
    %c0_69 = arith.constant 0 : index
    %c1408 = arith.constant 1408 : index
    %249 = vector.load %arg10[%c0_69, %c1408] : memref<8x2688xf32, #tpu.memory_space<vmem>>, vector<8x32xf32>
    %250 = vector.extract_strided_slice %187 {offsets = [0, 12], sizes = [8, 1], strides = [1, 1]} : vector<8x32xf32> to vector<8x1xf32>
    %251 = vector.broadcast %250 : vector<8x1xf32> to vector<8x32xf32>
    %252 = arith.mulf %251, %249 : vector<8x32xf32>
    %253 = arith.addf %248, %252 : vector<8x32xf32>
    %c0_70 = arith.constant 0 : index
    %c1440 = arith.constant 1440 : index
    %254 = vector.load %arg10[%c0_70, %c1440] : memref<8x2688xf32, #tpu.memory_space<vmem>>, vector<8x32xf32>
    %255 = vector.extract_strided_slice %187 {offsets = [0, 13], sizes = [8, 1], strides = [1, 1]} : vector<8x32xf32> to vector<8x1xf32>
    %256 = vector.broadcast %255 : vector<8x1xf32> to vector<8x32xf32>
    %257 = arith.mulf %256, %254 : vector<8x32xf32>
    %258 = arith.addf %253, %257 : vector<8x32xf32>
    %c0_71 = arith.constant 0 : index
    %c1472 = arith.constant 1472 : index
    %259 = vector.load %arg10[%c0_71, %c1472] : memref<8x2688xf32, #tpu.memory_space<vmem>>, vector<8x32xf32>
    %260 = vector.extract_strided_slice %187 {offsets = [0, 14], sizes = [8, 1], strides = [1, 1]} : vector<8x32xf32> to vector<8x1xf32>
    %261 = vector.broadcast %260 : vector<8x1xf32> to vector<8x32xf32>
    %262 = arith.mulf %261, %259 : vector<8x32xf32>
    %263 = arith.addf %258, %262 : vector<8x32xf32>
    %c0_72 = arith.constant 0 : index
    %c1504 = arith.constant 1504 : index
    %264 = vector.load %arg10[%c0_72, %c1504] : memref<8x2688xf32, #tpu.memory_space<vmem>>, vector<8x32xf32>
    %265 = vector.extract_strided_slice %187 {offsets = [0, 15], sizes = [8, 1], strides = [1, 1]} : vector<8x32xf32> to vector<8x1xf32>
    %266 = vector.broadcast %265 : vector<8x1xf32> to vector<8x32xf32>
    %267 = arith.mulf %266, %264 : vector<8x32xf32>
    %268 = arith.addf %263, %267 : vector<8x32xf32>
    %c0_73 = arith.constant 0 : index
    %c1536 = arith.constant 1536 : index
    %269 = vector.load %arg10[%c0_73, %c1536] : memref<8x2688xf32, #tpu.memory_space<vmem>>, vector<8x32xf32>
    %270 = vector.extract_strided_slice %187 {offsets = [0, 16], sizes = [8, 1], strides = [1, 1]} : vector<8x32xf32> to vector<8x1xf32>
    %271 = vector.broadcast %270 : vector<8x1xf32> to vector<8x32xf32>
    %272 = arith.mulf %271, %269 : vector<8x32xf32>
    %273 = arith.addf %268, %272 : vector<8x32xf32>
    %c0_74 = arith.constant 0 : index
    %c1568 = arith.constant 1568 : index
    %274 = vector.load %arg10[%c0_74, %c1568] : memref<8x2688xf32, #tpu.memory_space<vmem>>, vector<8x32xf32>
    %275 = vector.extract_strided_slice %187 {offsets = [0, 17], sizes = [8, 1], strides = [1, 1]} : vector<8x32xf32> to vector<8x1xf32>
    %276 = vector.broadcast %275 : vector<8x1xf32> to vector<8x32xf32>
    %277 = arith.mulf %276, %274 : vector<8x32xf32>
    %278 = arith.addf %273, %277 : vector<8x32xf32>
    %c0_75 = arith.constant 0 : index
    %c1600 = arith.constant 1600 : index
    %279 = vector.load %arg10[%c0_75, %c1600] : memref<8x2688xf32, #tpu.memory_space<vmem>>, vector<8x32xf32>
    %280 = vector.extract_strided_slice %187 {offsets = [0, 18], sizes = [8, 1], strides = [1, 1]} : vector<8x32xf32> to vector<8x1xf32>
    %281 = vector.broadcast %280 : vector<8x1xf32> to vector<8x32xf32>
    %282 = arith.mulf %281, %279 : vector<8x32xf32>
    %283 = arith.addf %278, %282 : vector<8x32xf32>
    %c0_76 = arith.constant 0 : index
    %c1632 = arith.constant 1632 : index
    %284 = vector.load %arg10[%c0_76, %c1632] : memref<8x2688xf32, #tpu.memory_space<vmem>>, vector<8x32xf32>
    %285 = vector.extract_strided_slice %187 {offsets = [0, 19], sizes = [8, 1], strides = [1, 1]} : vector<8x32xf32> to vector<8x1xf32>
    %286 = vector.broadcast %285 : vector<8x1xf32> to vector<8x32xf32>
    %287 = arith.mulf %286, %284 : vector<8x32xf32>
    %288 = arith.addf %283, %287 : vector<8x32xf32>
    %c0_77 = arith.constant 0 : index
    %c1664 = arith.constant 1664 : index
    %289 = vector.load %arg10[%c0_77, %c1664] : memref<8x2688xf32, #tpu.memory_space<vmem>>, vector<8x32xf32>
    %290 = vector.extract_strided_slice %187 {offsets = [0, 20], sizes = [8, 1], strides = [1, 1]} : vector<8x32xf32> to vector<8x1xf32>
    %291 = vector.broadcast %290 : vector<8x1xf32> to vector<8x32xf32>
    %292 = arith.mulf %291, %289 : vector<8x32xf32>
    %293 = arith.addf %288, %292 : vector<8x32xf32>
    %c0_78 = arith.constant 0 : index
    %c1696 = arith.constant 1696 : index
    %294 = vector.load %arg10[%c0_78, %c1696] : memref<8x2688xf32, #tpu.memory_space<vmem>>, vector<8x32xf32>
    %295 = vector.extract_strided_slice %187 {offsets = [0, 21], sizes = [8, 1], strides = [1, 1]} : vector<8x32xf32> to vector<8x1xf32>
    %296 = vector.broadcast %295 : vector<8x1xf32> to vector<8x32xf32>
    %297 = arith.mulf %296, %294 : vector<8x32xf32>
    %298 = arith.addf %293, %297 : vector<8x32xf32>
    %c0_79 = arith.constant 0 : index
    %c1728 = arith.constant 1728 : index
    %299 = vector.load %arg10[%c0_79, %c1728] : memref<8x2688xf32, #tpu.memory_space<vmem>>, vector<8x32xf32>
    %300 = vector.extract_strided_slice %187 {offsets = [0, 22], sizes = [8, 1], strides = [1, 1]} : vector<8x32xf32> to vector<8x1xf32>
    %301 = vector.broadcast %300 : vector<8x1xf32> to vector<8x32xf32>
    %302 = arith.mulf %301, %299 : vector<8x32xf32>
    %303 = arith.addf %298, %302 : vector<8x32xf32>
    %c0_80 = arith.constant 0 : index
    %c1760 = arith.constant 1760 : index
    %304 = vector.load %arg10[%c0_80, %c1760] : memref<8x2688xf32, #tpu.memory_space<vmem>>, vector<8x32xf32>
    %305 = vector.extract_strided_slice %187 {offsets = [0, 23], sizes = [8, 1], strides = [1, 1]} : vector<8x32xf32> to vector<8x1xf32>
    %306 = vector.broadcast %305 : vector<8x1xf32> to vector<8x32xf32>
    %307 = arith.mulf %306, %304 : vector<8x32xf32>
    %308 = arith.addf %303, %307 : vector<8x32xf32>
    %c0_81 = arith.constant 0 : index
    %c1792 = arith.constant 1792 : index
    %309 = vector.load %arg10[%c0_81, %c1792] : memref<8x2688xf32, #tpu.memory_space<vmem>>, vector<8x32xf32>
    %310 = vector.extract_strided_slice %187 {offsets = [0, 24], sizes = [8, 1], strides = [1, 1]} : vector<8x32xf32> to vector<8x1xf32>
    %311 = vector.broadcast %310 : vector<8x1xf32> to vector<8x32xf32>
    %312 = arith.mulf %311, %309 : vector<8x32xf32>
    %313 = arith.addf %308, %312 : vector<8x32xf32>
    %c0_82 = arith.constant 0 : index
    %c1824 = arith.constant 1824 : index
    %314 = vector.load %arg10[%c0_82, %c1824] : memref<8x2688xf32, #tpu.memory_space<vmem>>, vector<8x32xf32>
    %315 = vector.extract_strided_slice %187 {offsets = [0, 25], sizes = [8, 1], strides = [1, 1]} : vector<8x32xf32> to vector<8x1xf32>
    %316 = vector.broadcast %315 : vector<8x1xf32> to vector<8x32xf32>
    %317 = arith.mulf %316, %314 : vector<8x32xf32>
    %318 = arith.addf %313, %317 : vector<8x32xf32>
    %c0_83 = arith.constant 0 : index
    %c1856 = arith.constant 1856 : index
    %319 = vector.load %arg10[%c0_83, %c1856] : memref<8x2688xf32, #tpu.memory_space<vmem>>, vector<8x32xf32>
    %320 = vector.extract_strided_slice %187 {offsets = [0, 26], sizes = [8, 1], strides = [1, 1]} : vector<8x32xf32> to vector<8x1xf32>
    %321 = vector.broadcast %320 : vector<8x1xf32> to vector<8x32xf32>
    %322 = arith.mulf %321, %319 : vector<8x32xf32>
    %323 = arith.addf %318, %322 : vector<8x32xf32>
    %c0_84 = arith.constant 0 : index
    %c1888 = arith.constant 1888 : index
    %324 = vector.load %arg10[%c0_84, %c1888] : memref<8x2688xf32, #tpu.memory_space<vmem>>, vector<8x32xf32>
    %325 = vector.extract_strided_slice %187 {offsets = [0, 27], sizes = [8, 1], strides = [1, 1]} : vector<8x32xf32> to vector<8x1xf32>
    %326 = vector.broadcast %325 : vector<8x1xf32> to vector<8x32xf32>
    %327 = arith.mulf %326, %324 : vector<8x32xf32>
    %328 = arith.addf %323, %327 : vector<8x32xf32>
    %c0_85 = arith.constant 0 : index
    %c1920 = arith.constant 1920 : index
    %329 = vector.load %arg10[%c0_85, %c1920] : memref<8x2688xf32, #tpu.memory_space<vmem>>, vector<8x32xf32>
    %330 = vector.extract_strided_slice %187 {offsets = [0, 28], sizes = [8, 1], strides = [1, 1]} : vector<8x32xf32> to vector<8x1xf32>
    %331 = vector.broadcast %330 : vector<8x1xf32> to vector<8x32xf32>
    %332 = arith.mulf %331, %329 : vector<8x32xf32>
    %333 = arith.addf %328, %332 : vector<8x32xf32>
    %c0_86 = arith.constant 0 : index
    %c1952 = arith.constant 1952 : index
    %334 = vector.load %arg10[%c0_86, %c1952] : memref<8x2688xf32, #tpu.memory_space<vmem>>, vector<8x32xf32>
    %335 = vector.extract_strided_slice %187 {offsets = [0, 29], sizes = [8, 1], strides = [1, 1]} : vector<8x32xf32> to vector<8x1xf32>
    %336 = vector.broadcast %335 : vector<8x1xf32> to vector<8x32xf32>
    %337 = arith.mulf %336, %334 : vector<8x32xf32>
    %338 = arith.addf %333, %337 : vector<8x32xf32>
    %c0_87 = arith.constant 0 : index
    %c1984 = arith.constant 1984 : index
    %339 = vector.load %arg10[%c0_87, %c1984] : memref<8x2688xf32, #tpu.memory_space<vmem>>, vector<8x32xf32>
    %340 = vector.extract_strided_slice %187 {offsets = [0, 30], sizes = [8, 1], strides = [1, 1]} : vector<8x32xf32> to vector<8x1xf32>
    %341 = vector.broadcast %340 : vector<8x1xf32> to vector<8x32xf32>
    %342 = arith.mulf %341, %339 : vector<8x32xf32>
    %343 = arith.addf %338, %342 : vector<8x32xf32>
    %c0_88 = arith.constant 0 : index
    %c2016 = arith.constant 2016 : index
    %344 = vector.load %arg10[%c0_88, %c2016] : memref<8x2688xf32, #tpu.memory_space<vmem>>, vector<8x32xf32>
    %345 = vector.extract_strided_slice %187 {offsets = [0, 31], sizes = [8, 1], strides = [1, 1]} : vector<8x32xf32> to vector<8x1xf32>
    %346 = vector.broadcast %345 : vector<8x1xf32> to vector<8x32xf32>
    %347 = arith.mulf %346, %344 : vector<8x32xf32>
    %348 = arith.addf %343, %347 : vector<8x32xf32>
    %cst_89 = arith.constant 0.000000e+00 : f32
    %349 = vector.broadcast %cst_89 : f32 to vector<8x32xf32>
    %350 = arith.maximumf %348, %349 : vector<8x32xf32>
    %c0_90 = arith.constant 0 : index
    %c2624 = arith.constant 2624 : index
    %351 = vector.load %arg10[%c0_90, %c2624] : memref<8x2688xf32, #tpu.memory_space<vmem>>, vector<8x16xf32>
    %c0_91 = arith.constant 0 : index
    %c2048 = arith.constant 2048 : index
    %352 = vector.load %arg10[%c0_91, %c2048] : memref<8x2688xf32, #tpu.memory_space<vmem>>, vector<8x16xf32>
    %353 = vector.extract_strided_slice %350 {offsets = [0, 0], sizes = [8, 1], strides = [1, 1]} : vector<8x32xf32> to vector<8x1xf32>
    %354 = vector.broadcast %353 : vector<8x1xf32> to vector<8x16xf32>
    %355 = arith.mulf %354, %352 : vector<8x16xf32>
    %356 = arith.addf %351, %355 : vector<8x16xf32>
    %c0_92 = arith.constant 0 : index
    %c2064 = arith.constant 2064 : index
    %357 = vector.load %arg10[%c0_92, %c2064] : memref<8x2688xf32, #tpu.memory_space<vmem>>, vector<8x16xf32>
    %358 = vector.extract_strided_slice %350 {offsets = [0, 1], sizes = [8, 1], strides = [1, 1]} : vector<8x32xf32> to vector<8x1xf32>
    %359 = vector.broadcast %358 : vector<8x1xf32> to vector<8x16xf32>
    %360 = arith.mulf %359, %357 : vector<8x16xf32>
    %361 = arith.addf %356, %360 : vector<8x16xf32>
    %c0_93 = arith.constant 0 : index
    %c2080 = arith.constant 2080 : index
    %362 = vector.load %arg10[%c0_93, %c2080] : memref<8x2688xf32, #tpu.memory_space<vmem>>, vector<8x16xf32>
    %363 = vector.extract_strided_slice %350 {offsets = [0, 2], sizes = [8, 1], strides = [1, 1]} : vector<8x32xf32> to vector<8x1xf32>
    %364 = vector.broadcast %363 : vector<8x1xf32> to vector<8x16xf32>
    %365 = arith.mulf %364, %362 : vector<8x16xf32>
    %366 = arith.addf %361, %365 : vector<8x16xf32>
    %c0_94 = arith.constant 0 : index
    %c2096 = arith.constant 2096 : index
    %367 = vector.load %arg10[%c0_94, %c2096] : memref<8x2688xf32, #tpu.memory_space<vmem>>, vector<8x16xf32>
    %368 = vector.extract_strided_slice %350 {offsets = [0, 3], sizes = [8, 1], strides = [1, 1]} : vector<8x32xf32> to vector<8x1xf32>
    %369 = vector.broadcast %368 : vector<8x1xf32> to vector<8x16xf32>
    %370 = arith.mulf %369, %367 : vector<8x16xf32>
    %371 = arith.addf %366, %370 : vector<8x16xf32>
    %c0_95 = arith.constant 0 : index
    %c2112 = arith.constant 2112 : index
    %372 = vector.load %arg10[%c0_95, %c2112] : memref<8x2688xf32, #tpu.memory_space<vmem>>, vector<8x16xf32>
    %373 = vector.extract_strided_slice %350 {offsets = [0, 4], sizes = [8, 1], strides = [1, 1]} : vector<8x32xf32> to vector<8x1xf32>
    %374 = vector.broadcast %373 : vector<8x1xf32> to vector<8x16xf32>
    %375 = arith.mulf %374, %372 : vector<8x16xf32>
    %376 = arith.addf %371, %375 : vector<8x16xf32>
    %c0_96 = arith.constant 0 : index
    %c2128 = arith.constant 2128 : index
    %377 = vector.load %arg10[%c0_96, %c2128] : memref<8x2688xf32, #tpu.memory_space<vmem>>, vector<8x16xf32>
    %378 = vector.extract_strided_slice %350 {offsets = [0, 5], sizes = [8, 1], strides = [1, 1]} : vector<8x32xf32> to vector<8x1xf32>
    %379 = vector.broadcast %378 : vector<8x1xf32> to vector<8x16xf32>
    %380 = arith.mulf %379, %377 : vector<8x16xf32>
    %381 = arith.addf %376, %380 : vector<8x16xf32>
    %c0_97 = arith.constant 0 : index
    %c2144 = arith.constant 2144 : index
    %382 = vector.load %arg10[%c0_97, %c2144] : memref<8x2688xf32, #tpu.memory_space<vmem>>, vector<8x16xf32>
    %383 = vector.extract_strided_slice %350 {offsets = [0, 6], sizes = [8, 1], strides = [1, 1]} : vector<8x32xf32> to vector<8x1xf32>
    %384 = vector.broadcast %383 : vector<8x1xf32> to vector<8x16xf32>
    %385 = arith.mulf %384, %382 : vector<8x16xf32>
    %386 = arith.addf %381, %385 : vector<8x16xf32>
    %c0_98 = arith.constant 0 : index
    %c2160 = arith.constant 2160 : index
    %387 = vector.load %arg10[%c0_98, %c2160] : memref<8x2688xf32, #tpu.memory_space<vmem>>, vector<8x16xf32>
    %388 = vector.extract_strided_slice %350 {offsets = [0, 7], sizes = [8, 1], strides = [1, 1]} : vector<8x32xf32> to vector<8x1xf32>
    %389 = vector.broadcast %388 : vector<8x1xf32> to vector<8x16xf32>
    %390 = arith.mulf %389, %387 : vector<8x16xf32>
    %391 = arith.addf %386, %390 : vector<8x16xf32>
    %c0_99 = arith.constant 0 : index
    %c2176 = arith.constant 2176 : index
    %392 = vector.load %arg10[%c0_99, %c2176] : memref<8x2688xf32, #tpu.memory_space<vmem>>, vector<8x16xf32>
    %393 = vector.extract_strided_slice %350 {offsets = [0, 8], sizes = [8, 1], strides = [1, 1]} : vector<8x32xf32> to vector<8x1xf32>
    %394 = vector.broadcast %393 : vector<8x1xf32> to vector<8x16xf32>
    %395 = arith.mulf %394, %392 : vector<8x16xf32>
    %396 = arith.addf %391, %395 : vector<8x16xf32>
    %c0_100 = arith.constant 0 : index
    %c2192 = arith.constant 2192 : index
    %397 = vector.load %arg10[%c0_100, %c2192] : memref<8x2688xf32, #tpu.memory_space<vmem>>, vector<8x16xf32>
    %398 = vector.extract_strided_slice %350 {offsets = [0, 9], sizes = [8, 1], strides = [1, 1]} : vector<8x32xf32> to vector<8x1xf32>
    %399 = vector.broadcast %398 : vector<8x1xf32> to vector<8x16xf32>
    %400 = arith.mulf %399, %397 : vector<8x16xf32>
    %401 = arith.addf %396, %400 : vector<8x16xf32>
    %c0_101 = arith.constant 0 : index
    %c2208 = arith.constant 2208 : index
    %402 = vector.load %arg10[%c0_101, %c2208] : memref<8x2688xf32, #tpu.memory_space<vmem>>, vector<8x16xf32>
    %403 = vector.extract_strided_slice %350 {offsets = [0, 10], sizes = [8, 1], strides = [1, 1]} : vector<8x32xf32> to vector<8x1xf32>
    %404 = vector.broadcast %403 : vector<8x1xf32> to vector<8x16xf32>
    %405 = arith.mulf %404, %402 : vector<8x16xf32>
    %406 = arith.addf %401, %405 : vector<8x16xf32>
    %c0_102 = arith.constant 0 : index
    %c2224 = arith.constant 2224 : index
    %407 = vector.load %arg10[%c0_102, %c2224] : memref<8x2688xf32, #tpu.memory_space<vmem>>, vector<8x16xf32>
    %408 = vector.extract_strided_slice %350 {offsets = [0, 11], sizes = [8, 1], strides = [1, 1]} : vector<8x32xf32> to vector<8x1xf32>
    %409 = vector.broadcast %408 : vector<8x1xf32> to vector<8x16xf32>
    %410 = arith.mulf %409, %407 : vector<8x16xf32>
    %411 = arith.addf %406, %410 : vector<8x16xf32>
    %c0_103 = arith.constant 0 : index
    %c2240 = arith.constant 2240 : index
    %412 = vector.load %arg10[%c0_103, %c2240] : memref<8x2688xf32, #tpu.memory_space<vmem>>, vector<8x16xf32>
    %413 = vector.extract_strided_slice %350 {offsets = [0, 12], sizes = [8, 1], strides = [1, 1]} : vector<8x32xf32> to vector<8x1xf32>
    %414 = vector.broadcast %413 : vector<8x1xf32> to vector<8x16xf32>
    %415 = arith.mulf %414, %412 : vector<8x16xf32>
    %416 = arith.addf %411, %415 : vector<8x16xf32>
    %c0_104 = arith.constant 0 : index
    %c2256 = arith.constant 2256 : index
    %417 = vector.load %arg10[%c0_104, %c2256] : memref<8x2688xf32, #tpu.memory_space<vmem>>, vector<8x16xf32>
    %418 = vector.extract_strided_slice %350 {offsets = [0, 13], sizes = [8, 1], strides = [1, 1]} : vector<8x32xf32> to vector<8x1xf32>
    %419 = vector.broadcast %418 : vector<8x1xf32> to vector<8x16xf32>
    %420 = arith.mulf %419, %417 : vector<8x16xf32>
    %421 = arith.addf %416, %420 : vector<8x16xf32>
    %c0_105 = arith.constant 0 : index
    %c2272 = arith.constant 2272 : index
    %422 = vector.load %arg10[%c0_105, %c2272] : memref<8x2688xf32, #tpu.memory_space<vmem>>, vector<8x16xf32>
    %423 = vector.extract_strided_slice %350 {offsets = [0, 14], sizes = [8, 1], strides = [1, 1]} : vector<8x32xf32> to vector<8x1xf32>
    %424 = vector.broadcast %423 : vector<8x1xf32> to vector<8x16xf32>
    %425 = arith.mulf %424, %422 : vector<8x16xf32>
    %426 = arith.addf %421, %425 : vector<8x16xf32>
    %c0_106 = arith.constant 0 : index
    %c2288 = arith.constant 2288 : index
    %427 = vector.load %arg10[%c0_106, %c2288] : memref<8x2688xf32, #tpu.memory_space<vmem>>, vector<8x16xf32>
    %428 = vector.extract_strided_slice %350 {offsets = [0, 15], sizes = [8, 1], strides = [1, 1]} : vector<8x32xf32> to vector<8x1xf32>
    %429 = vector.broadcast %428 : vector<8x1xf32> to vector<8x16xf32>
    %430 = arith.mulf %429, %427 : vector<8x16xf32>
    %431 = arith.addf %426, %430 : vector<8x16xf32>
    %c0_107 = arith.constant 0 : index
    %c2304 = arith.constant 2304 : index
    %432 = vector.load %arg10[%c0_107, %c2304] : memref<8x2688xf32, #tpu.memory_space<vmem>>, vector<8x16xf32>
    %433 = vector.extract_strided_slice %350 {offsets = [0, 16], sizes = [8, 1], strides = [1, 1]} : vector<8x32xf32> to vector<8x1xf32>
    %434 = vector.broadcast %433 : vector<8x1xf32> to vector<8x16xf32>
    %435 = arith.mulf %434, %432 : vector<8x16xf32>
    %436 = arith.addf %431, %435 : vector<8x16xf32>
    %c0_108 = arith.constant 0 : index
    %c2320 = arith.constant 2320 : index
    %437 = vector.load %arg10[%c0_108, %c2320] : memref<8x2688xf32, #tpu.memory_space<vmem>>, vector<8x16xf32>
    %438 = vector.extract_strided_slice %350 {offsets = [0, 17], sizes = [8, 1], strides = [1, 1]} : vector<8x32xf32> to vector<8x1xf32>
    %439 = vector.broadcast %438 : vector<8x1xf32> to vector<8x16xf32>
    %440 = arith.mulf %439, %437 : vector<8x16xf32>
    %441 = arith.addf %436, %440 : vector<8x16xf32>
    %c0_109 = arith.constant 0 : index
    %c2336 = arith.constant 2336 : index
    %442 = vector.load %arg10[%c0_109, %c2336] : memref<8x2688xf32, #tpu.memory_space<vmem>>, vector<8x16xf32>
    %443 = vector.extract_strided_slice %350 {offsets = [0, 18], sizes = [8, 1], strides = [1, 1]} : vector<8x32xf32> to vector<8x1xf32>
    %444 = vector.broadcast %443 : vector<8x1xf32> to vector<8x16xf32>
    %445 = arith.mulf %444, %442 : vector<8x16xf32>
    %446 = arith.addf %441, %445 : vector<8x16xf32>
    %c0_110 = arith.constant 0 : index
    %c2352 = arith.constant 2352 : index
    %447 = vector.load %arg10[%c0_110, %c2352] : memref<8x2688xf32, #tpu.memory_space<vmem>>, vector<8x16xf32>
    %448 = vector.extract_strided_slice %350 {offsets = [0, 19], sizes = [8, 1], strides = [1, 1]} : vector<8x32xf32> to vector<8x1xf32>
    %449 = vector.broadcast %448 : vector<8x1xf32> to vector<8x16xf32>
    %450 = arith.mulf %449, %447 : vector<8x16xf32>
    %451 = arith.addf %446, %450 : vector<8x16xf32>
    %c0_111 = arith.constant 0 : index
    %c2368 = arith.constant 2368 : index
    %452 = vector.load %arg10[%c0_111, %c2368] : memref<8x2688xf32, #tpu.memory_space<vmem>>, vector<8x16xf32>
    %453 = vector.extract_strided_slice %350 {offsets = [0, 20], sizes = [8, 1], strides = [1, 1]} : vector<8x32xf32> to vector<8x1xf32>
    %454 = vector.broadcast %453 : vector<8x1xf32> to vector<8x16xf32>
    %455 = arith.mulf %454, %452 : vector<8x16xf32>
    %456 = arith.addf %451, %455 : vector<8x16xf32>
    %c0_112 = arith.constant 0 : index
    %c2384 = arith.constant 2384 : index
    %457 = vector.load %arg10[%c0_112, %c2384] : memref<8x2688xf32, #tpu.memory_space<vmem>>, vector<8x16xf32>
    %458 = vector.extract_strided_slice %350 {offsets = [0, 21], sizes = [8, 1], strides = [1, 1]} : vector<8x32xf32> to vector<8x1xf32>
    %459 = vector.broadcast %458 : vector<8x1xf32> to vector<8x16xf32>
    %460 = arith.mulf %459, %457 : vector<8x16xf32>
    %461 = arith.addf %456, %460 : vector<8x16xf32>
    %c0_113 = arith.constant 0 : index
    %c2400 = arith.constant 2400 : index
    %462 = vector.load %arg10[%c0_113, %c2400] : memref<8x2688xf32, #tpu.memory_space<vmem>>, vector<8x16xf32>
    %463 = vector.extract_strided_slice %350 {offsets = [0, 22], sizes = [8, 1], strides = [1, 1]} : vector<8x32xf32> to vector<8x1xf32>
    %464 = vector.broadcast %463 : vector<8x1xf32> to vector<8x16xf32>
    %465 = arith.mulf %464, %462 : vector<8x16xf32>
    %466 = arith.addf %461, %465 : vector<8x16xf32>
    %c0_114 = arith.constant 0 : index
    %c2416 = arith.constant 2416 : index
    %467 = vector.load %arg10[%c0_114, %c2416] : memref<8x2688xf32, #tpu.memory_space<vmem>>, vector<8x16xf32>
    %468 = vector.extract_strided_slice %350 {offsets = [0, 23], sizes = [8, 1], strides = [1, 1]} : vector<8x32xf32> to vector<8x1xf32>
    %469 = vector.broadcast %468 : vector<8x1xf32> to vector<8x16xf32>
    %470 = arith.mulf %469, %467 : vector<8x16xf32>
    %471 = arith.addf %466, %470 : vector<8x16xf32>
    %c0_115 = arith.constant 0 : index
    %c2432 = arith.constant 2432 : index
    %472 = vector.load %arg10[%c0_115, %c2432] : memref<8x2688xf32, #tpu.memory_space<vmem>>, vector<8x16xf32>
    %473 = vector.extract_strided_slice %350 {offsets = [0, 24], sizes = [8, 1], strides = [1, 1]} : vector<8x32xf32> to vector<8x1xf32>
    %474 = vector.broadcast %473 : vector<8x1xf32> to vector<8x16xf32>
    %475 = arith.mulf %474, %472 : vector<8x16xf32>
    %476 = arith.addf %471, %475 : vector<8x16xf32>
    %c0_116 = arith.constant 0 : index
    %c2448 = arith.constant 2448 : index
    %477 = vector.load %arg10[%c0_116, %c2448] : memref<8x2688xf32, #tpu.memory_space<vmem>>, vector<8x16xf32>
    %478 = vector.extract_strided_slice %350 {offsets = [0, 25], sizes = [8, 1], strides = [1, 1]} : vector<8x32xf32> to vector<8x1xf32>
    %479 = vector.broadcast %478 : vector<8x1xf32> to vector<8x16xf32>
    %480 = arith.mulf %479, %477 : vector<8x16xf32>
    %481 = arith.addf %476, %480 : vector<8x16xf32>
    %c0_117 = arith.constant 0 : index
    %c2464 = arith.constant 2464 : index
    %482 = vector.load %arg10[%c0_117, %c2464] : memref<8x2688xf32, #tpu.memory_space<vmem>>, vector<8x16xf32>
    %483 = vector.extract_strided_slice %350 {offsets = [0, 26], sizes = [8, 1], strides = [1, 1]} : vector<8x32xf32> to vector<8x1xf32>
    %484 = vector.broadcast %483 : vector<8x1xf32> to vector<8x16xf32>
    %485 = arith.mulf %484, %482 : vector<8x16xf32>
    %486 = arith.addf %481, %485 : vector<8x16xf32>
    %c0_118 = arith.constant 0 : index
    %c2480 = arith.constant 2480 : index
    %487 = vector.load %arg10[%c0_118, %c2480] : memref<8x2688xf32, #tpu.memory_space<vmem>>, vector<8x16xf32>
    %488 = vector.extract_strided_slice %350 {offsets = [0, 27], sizes = [8, 1], strides = [1, 1]} : vector<8x32xf32> to vector<8x1xf32>
    %489 = vector.broadcast %488 : vector<8x1xf32> to vector<8x16xf32>
    %490 = arith.mulf %489, %487 : vector<8x16xf32>
    %491 = arith.addf %486, %490 : vector<8x16xf32>
    %c0_119 = arith.constant 0 : index
    %c2496 = arith.constant 2496 : index
    %492 = vector.load %arg10[%c0_119, %c2496] : memref<8x2688xf32, #tpu.memory_space<vmem>>, vector<8x16xf32>
    %493 = vector.extract_strided_slice %350 {offsets = [0, 28], sizes = [8, 1], strides = [1, 1]} : vector<8x32xf32> to vector<8x1xf32>
    %494 = vector.broadcast %493 : vector<8x1xf32> to vector<8x16xf32>
    %495 = arith.mulf %494, %492 : vector<8x16xf32>
    %496 = arith.addf %491, %495 : vector<8x16xf32>
    %c0_120 = arith.constant 0 : index
    %c2512 = arith.constant 2512 : index
    %497 = vector.load %arg10[%c0_120, %c2512] : memref<8x2688xf32, #tpu.memory_space<vmem>>, vector<8x16xf32>
    %498 = vector.extract_strided_slice %350 {offsets = [0, 29], sizes = [8, 1], strides = [1, 1]} : vector<8x32xf32> to vector<8x1xf32>
    %499 = vector.broadcast %498 : vector<8x1xf32> to vector<8x16xf32>
    %500 = arith.mulf %499, %497 : vector<8x16xf32>
    %501 = arith.addf %496, %500 : vector<8x16xf32>
    %c0_121 = arith.constant 0 : index
    %c2528 = arith.constant 2528 : index
    %502 = vector.load %arg10[%c0_121, %c2528] : memref<8x2688xf32, #tpu.memory_space<vmem>>, vector<8x16xf32>
    %503 = vector.extract_strided_slice %350 {offsets = [0, 30], sizes = [8, 1], strides = [1, 1]} : vector<8x32xf32> to vector<8x1xf32>
    %504 = vector.broadcast %503 : vector<8x1xf32> to vector<8x16xf32>
    %505 = arith.mulf %504, %502 : vector<8x16xf32>
    %506 = arith.addf %501, %505 : vector<8x16xf32>
    %c0_122 = arith.constant 0 : index
    %c2544 = arith.constant 2544 : index
    %507 = vector.load %arg10[%c0_122, %c2544] : memref<8x2688xf32, #tpu.memory_space<vmem>>, vector<8x16xf32>
    %508 = vector.extract_strided_slice %350 {offsets = [0, 31], sizes = [8, 1], strides = [1, 1]} : vector<8x32xf32> to vector<8x1xf32>
    %509 = vector.broadcast %508 : vector<8x1xf32> to vector<8x16xf32>
    %510 = arith.mulf %509, %507 : vector<8x16xf32>
    %511 = arith.addf %506, %510 : vector<8x16xf32>
    %cst_123 = arith.constant dense<0xFF800000> : vector<8xf32>
    %512 = vector.multi_reduction <maximumf>, %511, %cst_123 [1] : vector<8x16xf32> to vector<8xf32>
    %513 = vector.shape_cast %512 : vector<8xf32> to vector<8x1xf32>
    %514 = vector.broadcast %513 : vector<8x1xf32> to vector<8x16xf32>
    %515 = arith.subf %511, %514 : vector<8x16xf32>
    %516 = math.exp %515 : vector<8x16xf32>
    %cst_124 = arith.constant dense<0.000000e+00> : vector<8xf32>
    %517 = vector.multi_reduction <add>, %516, %cst_124 [1] : vector<8x16xf32> to vector<8xf32>
    %518 = vector.shape_cast %517 : vector<8xf32> to vector<8x1xf32>
    %519 = math.log %518 : vector<8x1xf32>
    %520 = vector.broadcast %519 : vector<8x1xf32> to vector<8x16xf32>
    %521 = arith.subf %515, %520 : vector<8x16xf32>
    %c0_125 = arith.constant 0 : index
    %c0_126 = arith.constant 0 : index
    %522 = vector.load %arg0[%c0_125, %c0_126] : memref<8x16xf32, #tpu.memory_space<vmem>>, vector<8x16xf32>
    %523 = arith.addf %511, %522 : vector<8x16xf32>
    %524 = tpu.iota {dimensions = array<i32: 1>} : vector<8x16xi32>
    %cst_127 = arith.constant dense<0xFF800000> : vector<8xf32>
    %525 = vector.multi_reduction <maximumf>, %523, %cst_127 [1] : vector<8x16xf32> to vector<8xf32>
    %526 = vector.shape_cast %525 : vector<8xf32> to vector<8x1xf32>
    %527 = vector.broadcast %526 : vector<8x1xf32> to vector<8x16xf32>
    %528 = arith.cmpf oeq, %523, %527 : vector<8x16xf32>
    %c16_i32 = arith.constant 16 : i32
    %529 = vector.broadcast %c16_i32 : i32 to vector<8x16xi32>
    %530 = arith.select %528, %524, %529 : vector<8x16xi1>, vector<8x16xi32>
    %cst_128 = arith.constant dense<2147483647> : vector<8xi32>
    %531 = vector.multi_reduction <minsi>, %530, %cst_128 [1] : vector<8x16xi32> to vector<8xi32>
    %532 = vector.shape_cast %531 : vector<8xi32> to vector<8x1xi32>
    %533 = vector.broadcast %532 : vector<8x1xi32> to vector<8x16xi32>
    %534 = arith.cmpi eq, %524, %533 : vector<8x16xi32>
    %cst_129 = arith.constant 0.000000e+00 : f32
    %535 = vector.broadcast %cst_129 : f32 to vector<8x16xf32>
    %536 = arith.select %534, %521, %535 : vector<8x16xi1>, vector<8x16xf32>
    %cst_130 = arith.constant dense<0.000000e+00> : vector<8xf32>
    %537 = vector.multi_reduction <add>, %536, %cst_130 [1] : vector<8x16xf32> to vector<8xf32>
    %538 = vector.shape_cast %537 : vector<8xf32> to vector<8x1xf32>
    %539 = tpu.iota {dimensions = array<i32: 1>} : vector<8x128xi32>
    %c0_i32 = arith.constant 0 : i32
    %540 = vector.broadcast %c0_i32 : i32 to vector<8x128xi32>
    %541 = arith.cmpi eq, %539, %540 : vector<8x128xi32>
    %542 = arith.sitofp %532 : vector<8x1xi32> to vector<8x1xf32>
    %c1_i32 = arith.constant 1 : i32
    %543 = vector.broadcast %c1_i32 : i32 to vector<8x128xi32>
    %544 = arith.cmpi eq, %539, %543 : vector<8x128xi32>
    %cst_131 = arith.constant 0.000000e+00 : f32
    %545 = vector.shape_cast %538 : vector<8x1xf32> to vector<8x1xf32>
    %546 = vector.broadcast %545 : vector<8x1xf32> to vector<8x128xf32>
    %547 = vector.broadcast %cst_131 : f32 to vector<8x128xf32>
    %548 = arith.select %544, %546, %547 : vector<8x128xi1>, vector<8x128xf32>
    %549 = vector.shape_cast %542 : vector<8x1xf32> to vector<8x1xf32>
    %550 = vector.broadcast %549 : vector<8x1xf32> to vector<8x128xf32>
    %551 = arith.select %541, %550, %548 : vector<8x128xi1>, vector<8x128xf32>
    %c0_132 = arith.constant 0 : index
    %c0_133 = arith.constant 0 : index
    %552 = vector.load %arg9[%c0_132, %c0_133] : memref<8x128xf32, #tpu.memory_space<vmem>>, vector<8x128xf32>
    tpu.vector_store %arg9[%c0_132, %c0_133], %551 {strides = array<i32>} : memref<8x128xf32, #tpu.memory_space<vmem>>, vector<8x128xf32>,
    return
  }
}

</mosaic_0001>

<bundles_post_ra>
// kernel: h_actor_forward.1
= control target key start
LH: loop header
LB: loop body
LE: loop exit
PB: predicated region body
PF: predicated region fallthrough
CT: control target
= control target key end

     0   :  { %14 = vsyncpa [#allocation4], 0  ;;  %s2756_s30 = smov [#allocation3]   ;;  %s3486_s0 = inlined_call_operand.vmem [shape: f32[8,16], index: 0, kind: input, shape index: {}]   ;;  %s3487_s1 = inlined_call_operand.vmem [shape: f32[8,32], index: 1, kind: input, shape index: {}]   ;;  %s3488_s2 = inlined_call_operand.vmem [shape: bf16[32,64], index: 2, kind: input, shape index: {}]   ;;  %s3489_s3 = inlined_call_operand.vmem [shape: f32[1,64], index: 3, kind: input, shape index: {}]   ;;  %s3490_s4 = inlined_call_operand.vmem [shape: bf16[64,64], index: 4, kind: input, shape index: {}]   ;;  %s3491_s5 = inlined_call_operand.vmem [shape: f32[1,64], index: 5, kind: input, shape index: {}]   ;;  %s3492_s6 = inlined_call_operand.hbm [shape: bf16[64,2688], index: 6, kind: input, shape index: {}]   ;;  %s3493_s7 = inlined_call_operand.vmem [shape: f32[1,2688], index: 7, kind: input, shape index: {}]   ;;  %s3494_s8 = inlined_call_operand.vmem [shape: f32[8,32], index: 8, kind: input, shape index: {}]   ;;  %s3495_s9 = inlined_call_operand.vmem [shape: f32[8,128], index: 9, kind: output, shape index: {}]  }
   0x1   :  { %s32_s10 = sshll.u32 %s2756_s30, 4  ;;  %s2732_s13 = scalar_lea.hbm %s3492_s6, 10752  ;;  %s33_s10 = int_to_ptr.vmem [resolvable:$true] %s32_s10 }
   0x2   :  { %p2733_p0 = scmp.ne.s32.totalorder %s3492_s6, %s2732_s13  ;;  %p2736_p1 = scmp.lt.u32.totalorder %s2732_s13, %s3492_s6 }
   0x4   :  { %p2738_p2 = pnand %p2736_p1, %p2733_p0 }
   0x6   :  { %2741 = shalt.err (!%p2738_p2)
}
   0x7   :  { %s2742_s18 = scalar_lea.vmem %s33_s10, 10752  ;;  %p2747_p4 = scmp.lt.s32.totalorder %s33_s10, %s33_s10 }
   0x8   :  { %p2743_p3 = scmp.ne.s32.totalorder %s33_s10, %s2742_s18  ;;  %p2748_p5 = scmp.lt.s32.totalorder %s2742_s18, %s2742_s18 }
   0xa   :  { %p2749_p6 = por %p2748_p5, %p2747_p4 }
   0xc   :  { %p2750_p7 = pnand %p2749_p6, %p2743_p3 }
   0xe   :  { %2753 = shalt.err (!%p2750_p7)
}
   0xf   :  { %s2757_s19 = smov 1344   ;;  %s2758_s20 = smov 84  }
  0x10   :  { %38 = dma.hbm_to_vmem [thread:$0]  %s3492_s6, 10752, %s33_s10, [#allocation4], %s2757_s19, %s2757_s19, %s2758_s20  }
  0x11   :  { %2754 = dma.done.wait [#allocation4], 10752  }
  0x12   :  { %2755 = vsyncadd [#allocation4], 4294956544  ;;  %v2759_v0 = vmov 0.0   ;;  %vm2760_vm0 = vmmov 0   ;;  %v2598_v1 = vld [vmem:[%s3488_s2] sm:$0xff]   ;;  %v2599_v2 = vld [vmem:[%s3488_s2 + $0x8] sm:$0xff]  }
  0x13   :  { %2393 = vmatprep.subr.bf16.mxu0 %v2759_v0  ;;  %2397 = vmatprep.mubr.msk.bf16.mxu0 %vm2760_vm0, %v2759_v0  ;;  %v47_v3 = vld [vmem:[%s3487_s1] sm:$0xff]  ;;  %v2601_v5 = vld [vmem:[%s3490_s4 + $0x8] sm:$0xff]   ;;  %vm72_vm1 = vcmask 261120   ;;  %v2602_v7 = vld [vmem:[%s3490_s4 + $0x10] sm:$0xff]   ;;  %vm157_vm2 = vcmask 523264   ;;  %v2761_v35 = vmov 0  }
  0x14   :  { %2401 = vmatprep.subr.bf16.mxu1 %v2759_v0  ;;  %2409 = vmatprep.mubr.msk.bf16.mxu1 %vm2760_vm0, %v2759_v0  ;;  %v2600_v4 = vld [vmem:[%s3490_s4] sm:$0xff]   ;;  %v48_v6 = vpack.c.bf16 %v47_v3, %v47_v3  ;;  %v2603_v8 = vld [vmem:[%s3490_s4 + $0x18] sm:$0xff]   ;;  %v2618_v14 = vld [vmem:[#allocation3 + $0x154] ss:$84 sps:$4 sm:$0xff]   ;;  %v2762_v37 = vmov 3   ;;  %v3503_v38 = vmov 5  }
  0x15   :  { %2394 = vmatpush3.bf16.msra.mxu0 %v2598_v1  ;;  %2402 = vmatpush3.bf16.msra.mxu1 %v2600_v4  ;;  %v2604_v9 = vld [vmem:[#allocation3] ss:$84 sps:$4 sm:$0xff]   ;;  %v2606_v10 = vld [vmem:[#allocation3 + $0x4] ss:$84 sps:$4 sm:$0xff]   ;;  %v2610_v13 = vld [vmem:[#allocation3 + $0xa8] ss:$84 sps:$4 sm:$0xff]  }
  0x16   :  { %2395 = vmatprep.subr.bf16.mxu0 %v2759_v0  ;;  %2403 = vmatprep.subr.bf16.mxu1 %v2759_v0  ;;  %v2609_v11 = vld [vmem:[#allocation3 + $0xc] ss:$84 sps:$4 sm:$0xff]   ;;  %v2616_v15 = vld [vmem:[#allocation3 + $0x150] ss:$84 sps:$4 sm:$0xff]   ;;  %v2607_v23 = vld [vmem:[#allocation3 + $0x8] ss:$84 sps:$4 sm:$0xff]  }
  0x17   :  { %v2612_v12 = vld [vmem:[#allocation3 + $0xac] ss:$84 sps:$4 sm:$0xff]   ;;  %v2615_v25 = vld [vmem:[#allocation3 + $0xb4] ss:$84 sps:$4 sm:$0xff]   ;;  %v2613_v26 = vld [vmem:[#allocation3 + $0xb0] ss:$84 sps:$4 sm:$0xff]   ;;  %2503 = vset.pattern.permute.xlu1 %v2762_v37 }
  0x18   :  { %v2275_v16 = vld [vmem:[%s3489_s3] ss:$0 sm:$0xff]  ;;  %v2621_v27 = vld [vmem:[#allocation3 + $0x15c] ss:$84 sps:$4 sm:$0xff]   ;;  %v2619_v28 = vld [vmem:[#allocation3 + $0x158] ss:$84 sps:$4 sm:$0xff]  }
  0x19   :  { %2396 = vmatpush3.bf16.msra.mxu0 %v2599_v2  ;;  %2404 = vmatpush3.bf16.msra.mxu1 %v2601_v5  ;;  %v2624_v29 = vld [vmem:[#allocation3 + $0x1fc] ss:$84 sps:$4 sm:$0xff]   ;;  %v2627_v30 = vld [vmem:[#allocation3 + $0x204] ss:$84 sps:$4 sm:$0xff]   ;;  %v2625_v32 = vld [vmem:[#allocation3 + $0x200] ss:$84 sps:$4 sm:$0xff]  }
  0x1a   :  { %2405 = vmatprep.subr.bf16.mxu1 %v2759_v0  ;;  %829 = vmatprep.subr.bf16.mxu0 %v2606_v10  ;;  %v2622_v31 = vld [vmem:[#allocation3 + $0x1f8] ss:$84 sps:$4 sm:$0xff]   ;;  %v2630_v33 = vld [vmem:[#allocation3 + $0x14] ss:$84 sps:$4 sm:$0xff]   ;;  %v2633_v34 = vld [vmem:[#allocation3 + $0x1c] ss:$84 sps:$4 sm:$0xff]  }
  0x1b   :  { %v2934_v36 = vld [vmem:[%s3494_s8] sm:$0xff]  ;;  %v2764_v39 = vmov 6   ;;  %v3502_v40 = vmov 9   ;;  %v2766_v41 = vmov 10   ;;  %v3501_v42 = vmov 13   ;;  %s2789_s21 = smov 96  }
  0x1c   :  { %2398 = vmatmul.mubr.msk.bf16.vlgmr.msra.gmra.mrb[0].mxu0 %vm72_vm1, %v48_v6  ;;  %1331 = vperm.xlu1 %2503, %v2934_v36   ;;  %v2768_v43 = vmov 14   ;;  %v3500_v44 = vmov 17   ;;  %v2770_v45 = vmov 18   ;;  %v3499_v46 = vmov 21   ;;  %v2279_v62 = vld [vmem:[%s3491_s5] ss:$0 sm:$0xff] }
  0x1d   :  { %2406 = vmatpush3.bf16.msra.mxu1 %v2602_v7  ;;  %830 = vmatpush1.bf16.msra.mxu0 %v2604_v9  ;;  %v3509_v47 = vmov 22   ;;  %v3505_v48 = vmov 1   ;;  %v3498_v49 = vmov 25   ;;  %v3507_v50 = vmov 26   ;;  %v2628_v6 = vld [vmem:[#allocation3 + $0x10] ss:$84 sps:$4 sm:$0xff]  }
  0x1e   :  { %2407 = vmatprep.subr.bf16.mxu1 %v2759_v0  ;;  %831 = vmatprep.subr.bf16.mxu0 %v2612_v12  ;;  %v2776_v51 = vmov 2   ;;  %v2777_v52 = vmov 7   ;;  %v3497_v53 = vmov 29   ;;  %v2779_v54 = vmov 11   ;;  %v2631_v7 = vld [vmem:[#allocation3 + $0x18] ss:$84 sps:$4 sm:$0xff]  }
  0x1f   :  { %861 = vmatprep.mubr.bf16.mxu0 %v2761_v35  ;;  %2501 = vset.pattern.permute.xlu0 %v3505_v48  ;;  %v2780_v55 = vmov 31   ;;  %v2781_v56 = vmov 15   ;;  %v2782_v57 = vmov 4   ;;  %v2783_v58 = vmov 19   ;;  %v2636_v9 = vld [vmem:[#allocation3 + $0xbc] ss:$84 sps:$4 sm:$0xff]  }
  0x20   :  { %2504 = vset.pattern.permute.xlu1 %v3503_v38  ;;  %1311 = vperm.xlu0 %2501, %v2934_v36   ;;  %v3508_v59 = vmov 23   ;;  %v3506_v60 = vmov 27   ;;  %v3504_v61 = vmov 30   ;;  %v2639_v10 = vld [vmem:[#allocation3 + $0xc4] ss:$84 sps:$4 sm:$0xff]   ;;  %s2790_s22 = smov 32  }
  0x21   :  { %2408 = vmatpush3.bf16.msra.mxu1 %v2603_v8  ;;  %832 = vmatpush1.bf16.msra.mxu0 %v2610_v13  ;;  %v2637_v12 = vld [vmem:[#allocation3 + $0xc0] ss:$84 sps:$4 sm:$0xff]   ;;  %v2642_v13 = vld [vmem:[#allocation3 + $0x164] ss:$84 sps:$4 sm:$0xff]   ;;  %s2826_s23 = smov 48   ;;  %s2827_s24 = smov 112  }
  0x22   :  { %870 = vmatprep.subr.bf16.mxu1 %v2609_v11  ;;  %833 = vmatprep.subr.bf16.mxu0 %v2618_v14  ;;  %v2634_v11 = vld [vmem:[#allocation3 + $0xb8] ss:$84 sps:$4 sm:$0xff]   ;;  %s2828_s25 = smov 16   ;;  %s2829_s6 = smov 80   ;;  %vm2207_vm3 = vcmask 654848   ;;  %vm2218_vm5 = vcmask 130048  }
  0x23   :  { %1348 = vperm.xlu1 %2504, %v2934_v36   ;;  %v2645_v14 = vld [vmem:[#allocation3 + $0x16c] ss:$84 sps:$4 sm:$0xff]  }
  0x24   :  { %2502 = vset.pattern.permute.xlu0 %v2776_v51 }
  0x25   :  { %834 = vmatpush1.bf16.msra.mxu0 %v2616_v15  ;;  %1321 = vperm.xlu0 %2502, %v2934_v36   ;;  %v2640_v15 = vld [vmem:[#allocation3 + $0x160] ss:$84 sps:$4 sm:$0xff]  }
  0x26   :  { %835 = vmatprep.subr.bf16.mxu0 %v2624_v29  ;;  %v2666_v29 = vld [vmem:[#allocation3 + $0x174] ss:$84 sps:$4 sm:$0xff]  }
  0x27   :  { %2505 = vset.pattern.permute.xlu1 %v2764_v39 }
  0x28   :  { %1358 = vperm.xlu1 %2505, %v2934_v36  }
  0x29   :  { %836 = vmatpush1.bf16.msra.mxu0 %v2622_v31  ;;  %2506 = vset.pattern.permute.xlu0 %v2777_v52  ;;  %v2664_v31 = vld [vmem:[#allocation3 + $0x170] ss:$84 sps:$4 sm:$0xff]  }
  0x2a   :  { %911 = vmatprep.subr.bf16.mxu0 %v2630_v33  ;;  %1368 = vperm.xlu0 %2506, %v2934_v36   ;;  %v2672_v33 = vld [vmem:[#allocation3 + $0x21c] ss:$84 sps:$4 sm:$0xff]  }
  0x2c   :  { %2507 = vset.pattern.permute.xlu1 %v3502_v40 }
  0x2d   :  { %1385 = vperm.xlu1 %2507, %v2934_v36  }
  0x2e   :  { %2509 = vset.pattern.permute.xlu0 %v2779_v54 }
  0x2f   :  { %1405 = vperm.xlu0 %2509, %v2934_v36  }
  0x31   :  { %2508 = vset.pattern.permute.xlu1 %v2766_v41 }
  0x32   :  { %1395 = vperm.xlu1 %2508, %v2934_v36  }
  0x33   :  { %2512 = vset.pattern.permute.xlu0 %v2781_v56 }
  0x34   :  { %1442 = vperm.xlu0 %2512, %v2934_v36  }
  0x36   :  { %2510 = vset.pattern.permute.xlu1 %v3501_v42 }
  0x37   :  { %1422 = vperm.xlu1 %2510, %v2934_v36  }
  0x38   :  { %2515 = vset.pattern.permute.xlu0 %v2783_v58 }
  0x39   :  { %1479 = vperm.xlu0 %2515, %v2934_v36  }
  0x3b   :  { %2511 = vset.pattern.permute.xlu1 %v2768_v43 }
  0x3c   :  { %1432 = vperm.xlu1 %2511, %v2934_v36  }
  0x3d   :  { %2518 = vset.pattern.permute.xlu0 %v3508_v59 }
  0x3e   :  { %1516 = vperm.xlu0 %2518, %v2934_v36  }
  0x40   :  { %2513 = vset.pattern.permute.xlu1 %v3500_v44 }
  0x41   :  { %1459 = vperm.xlu1 %2513, %v2934_v36  }
  0x42   :  { %2521 = vset.pattern.permute.xlu0 %v3506_v60 }
  0x43   :  { %1553 = vperm.xlu0 %2521, %v2934_v36  }
  0x45   :  { %2514 = vset.pattern.permute.xlu1 %v2770_v45 }
  0x46   :  { %1469 = vperm.xlu1 %2514, %v2934_v36  }
  0x47   :  { %2524 = vset.pattern.permute.xlu0 %v3504_v61  ;;  %v2794_v61 = vmov 24  }
  0x48   :  { %1580 = vperm.xlu0 %2524, %v2934_v36  }
  0x4a   :  { %2516 = vset.pattern.permute.xlu1 %v3499_v46 }
  0x4b   :  { %1496 = vperm.xlu1 %2516, %v2934_v36  }
  0x4c   :  { %2533 = vset.pattern.permute.xlu0 %v2761_v35 }
  0x4f   :  { %2517 = vset.pattern.permute.xlu1 %v3509_v47 }
  0x50   :  { %1506 = vperm.xlu1 %2517, %v2934_v36  }
  0x54   :  { %2519 = vset.pattern.permute.xlu1 %v3498_v49 }
  0x55   :  { %1533 = vperm.xlu1 %2519, %v2934_v36  }
  0x59   :  { %2520 = vset.pattern.permute.xlu1 %v3507_v50 }
  0x5a   :  { %1543 = vperm.xlu1 %2520, %v2934_v36  }
  0x5e   :  { %2522 = vset.pattern.permute.xlu1 %v2761_v35 }
  0x5f   :  { %1305 = vperm.xlu1 %2522, %v2934_v36  }
  0x63   :  { %2523 = vset.pattern.permute.xlu1 %v3497_v53 }
  0x64   :  { %1570 = vperm.xlu1 %2523, %v2934_v36  }
  0x68   :  { %2525 = vset.pattern.permute.xlu1 %v2780_v55 }
  0x69   :  { %1590 = vperm.xlu1 %2525, %v2934_v36  }
  0x6d   :  { %2526 = vset.pattern.permute.xlu1 %v2782_v57 }
  0x6e   :  { %1342 = vperm.xlu1 %2526, %v2934_v36  }
  0xef   :  { %v110_v17 = vpop.f32.mrb[0].mxu0 }
  0xf0   :  { %v111_v18 = vadd.f32 %v2275_v16, %v110_v17  ;;  %v2399_v19 = vpop.f32.mrb[1].mxu0  ;;  %v2643_v16 = vld [vmem:[#allocation3 + $0x168] ss:$84 sps:$4 sm:$0xff]   ;;  %v2648_v17 = vld [vmem:[#allocation3 + $0x20c] ss:$84 sps:$4 sm:$0xff]  }
  0xf1   :  { %v113_v20 = vpop.f32.mrb[2].mxu0  ;;  %v2646_v19 = vld [vmem:[#allocation3 + $0x208] ss:$84 sps:$4 sm:$0xff]  }
  0xf2   :  { %v116_v21 = vmax.f32 %v111_v18, 0.0  ;;  %v2400_v22 = vpop.f32.mrb[3].mxu0  ;;  %v2651_v18 = vld [vmem:[#allocation3 + $0x214] ss:$84 sps:$4 sm:$0xff]   ;;  %v2649_v20 = vld [vmem:[#allocation3 + $0x210] ss:$84 sps:$4 sm:$0xff]  }
  0xf3   :  { %v2657_v22 = vld [vmem:[#allocation3 + $0x2c] ss:$84 sps:$4 sm:$0xff]  }
  0xf4   :  { %v117_v24 = vpack.c.bf16 %v116_v21, %v116_v21  ;;  %v2654_v21 = vld [vmem:[#allocation3 + $0x24] ss:$84 sps:$4 sm:$0xff]  }
  0xf6   :  { %2410 = vmatmul.mubr.msk.bf16.vlgmr.msra.gmra.mrb[0].mxu1 %vm157_vm2, %v117_v24  ;;  %v2655_v24 = vld [vmem:[#allocation3 + $0x28] ss:$84 sps:$4 sm:$0xff]  }
  0xf7   :  { %871 = vmatpush1.bf16.msra.mxu1 %v2607_v23  ;;  %902 = vmatprep.mubr.bf16.mxu1 %v2761_v35  ;;  %v2652_v23 = vld [vmem:[#allocation3 + $0x20] ss:$84 sps:$4 sm:$0xff]  }
  0xf8   :  { %872 = vmatprep.subr.bf16.mxu1 %v2615_v25  ;;  %v2660_v25 = vld [vmem:[#allocation3 + $0xcc] ss:$84 sps:$4 sm:$0xff]  }
  0xfb   :  { %873 = vmatpush1.bf16.msra.mxu1 %v2613_v26  ;;  %v2663_v26 = vld [vmem:[#allocation3 + $0xd4] ss:$84 sps:$4 sm:$0xff]  }
  0xfc   :  { %874 = vmatprep.subr.bf16.mxu1 %v2621_v27  ;;  %v2658_v27 = vld [vmem:[#allocation3 + $0xc8] ss:$84 sps:$4 sm:$0xff]  }
  0xff   :  { %875 = vmatpush1.bf16.msra.mxu1 %v2619_v28  ;;  %v2661_v28 = vld [vmem:[#allocation3 + $0xd0] ss:$84 sps:$4 sm:$0xff]  }
 0x100   :  { %876 = vmatprep.subr.bf16.mxu1 %v2627_v30  ;;  %v2669_v30 = vld [vmem:[#allocation3 + $0x17c] ss:$84 sps:$4 sm:$0xff]  }
 0x103   :  { %877 = vmatpush1.bf16.msra.mxu1 %v2625_v32  ;;  %v2667_v32 = vld [vmem:[#allocation3 + $0x178] ss:$84 sps:$4 sm:$0xff]  }
 0x104   :  { %952 = vmatprep.subr.bf16.mxu1 %v2633_v34  ;;  %v2675_v34 = vld [vmem:[#allocation3 + $0x224] ss:$84 sps:$4 sm:$0xff]  }
 0x1c9   :  { %v195_v63 = vpop.f32.mrb[0].mxu1 }
 0x1ca   :  { %v196_v1 = vadd.f32 %v2279_v62, %v195_v63  ;;  %v2411_v2 = vpop.f32.mrb[1].mxu1  ;;  %v2670_v62 = vld [vmem:[#allocation3 + $0x218] ss:$84 sps:$4 sm:$0xff]   ;;  %v2673_v63 = vld [vmem:[#allocation3 + $0x220] ss:$84 sps:$4 sm:$0xff]  }
 0x1cb   :  { %v198_v3 = vpop.f32.mrb[2].mxu1  ;;  %v2681_v2 = vld [vmem:[#allocation3 + $0x3c] ss:$84 sps:$4 sm:$0xff]  }
 0x1cc   :  { %v201_v4 = vmax.f32 %v196_v1, 0.0  ;;  %v2412_v5 = vpop.f32.mrb[3].mxu1  ;;  %v2678_v1 = vld [vmem:[#allocation3 + $0x34] ss:$84 sps:$4 sm:$0xff]   ;;  %v2676_v3 = vld [vmem:[#allocation3 + $0x30] ss:$84 sps:$4 sm:$0xff]  }
 0x1cd   :  { %v2684_v5 = vld [vmem:[#allocation3 + $0xdc] ss:$84 sps:$4 sm:$0xff]  }
 0x1ce   :  { %v2992_v8 = vpack.c.bf16 %v201_v4, %v201_v4  ;;  %v2679_v4 = vld [vmem:[#allocation3 + $0x38] ss:$84 sps:$4 sm:$0xff]  }
 0x1d0   :  { %2369 = vmatmul.mubr.msk.bf16.vlgmr.msra.gmra.mrb[4].mxu0 %vm157_vm2, %v2992_v8  ;;  %2370 = vmatmul.mubr.msk.bf16.vlgmr.msra.gmra.mrb[4].mxu1 %vm157_vm2, %v2992_v8 }
 0x1d1   :  { %912 = vmatpush1.bf16.msra.mxu0 %v2628_v6  ;;  %953 = vmatpush1.bf16.msra.mxu1 %v2631_v7  ;;  %v2687_v6 = vld [vmem:[#allocation3 + $0xe4] ss:$84 sps:$4 sm:$0xff]  }
 0x1d2   :  { %913 = vmatprep.subr.bf16.mxu0 %v2636_v9  ;;  %954 = vmatprep.subr.bf16.mxu1 %v2639_v10  ;;  %v2682_v7 = vld [vmem:[#allocation3 + $0xd8] ss:$84 sps:$4 sm:$0xff]   ;;  %v2685_v9 = vld [vmem:[#allocation3 + $0xe0] ss:$84 sps:$4 sm:$0xff]  }
 0x1d3   :  { %943 = vmatprep.mubr.bf16.mxu0 %v2761_v35  ;;  %984 = vmatprep.mubr.bf16.mxu1 %v2761_v35  ;;  %v2690_v10 = vld [vmem:[#allocation3 + $0x184] ss:$84 sps:$4 sm:$0xff]  }
 0x1d5   :  { %914 = vmatpush1.bf16.msra.mxu0 %v2634_v11  ;;  %955 = vmatpush1.bf16.msra.mxu1 %v2637_v12  ;;  %v2693_v11 = vld [vmem:[#allocation3 + $0x18c] ss:$84 sps:$4 sm:$0xff]  }
 0x1d6   :  { %915 = vmatprep.subr.bf16.mxu0 %v2642_v13  ;;  %956 = vmatprep.subr.bf16.mxu1 %v2645_v14  ;;  %v2688_v12 = vld [vmem:[#allocation3 + $0x180] ss:$84 sps:$4 sm:$0xff]   ;;  %v2691_v13 = vld [vmem:[#allocation3 + $0x188] ss:$84 sps:$4 sm:$0xff]  }
 0x1d7   :  { %v2696_v14 = vld [vmem:[#allocation3 + $0x22c] ss:$84 sps:$4 sm:$0xff]  }
 0x1d9   :  { %916 = vmatpush1.bf16.msra.mxu0 %v2640_v15  ;;  %957 = vmatpush1.bf16.msra.mxu1 %v2643_v16  ;;  %v2699_v15 = vld [vmem:[#allocation3 + $0x234] ss:$84 sps:$4 sm:$0xff]  }
 0x1da   :  { %917 = vmatprep.subr.bf16.mxu0 %v2648_v17  ;;  %958 = vmatprep.subr.bf16.mxu1 %v2651_v18  ;;  %v2694_v16 = vld [vmem:[#allocation3 + $0x228] ss:$84 sps:$4 sm:$0xff]   ;;  %v2697_v17 = vld [vmem:[#allocation3 + $0x230] ss:$84 sps:$4 sm:$0xff]  }
 0x1db   :  { %v2702_v18 = vld [vmem:[#allocation3 + $0x44] ss:$84 sps:$4 sm:$0xff]  }
 0x1dd   :  { %918 = vmatpush1.bf16.msra.mxu0 %v2646_v19  ;;  %959 = vmatpush1.bf16.msra.mxu1 %v2649_v20  ;;  %v2705_v19 = vld [vmem:[#allocation3 + $0x4c] ss:$84 sps:$4 sm:$0xff]  }
 0x1de   :  { %993 = vmatprep.subr.bf16.mxu0 %v2654_v21  ;;  %1034 = vmatprep.subr.bf16.mxu1 %v2657_v22  ;;  %v2700_v20 = vld [vmem:[#allocation3 + $0x40] ss:$84 sps:$4 sm:$0xff]   ;;  %v2703_v21 = vld [vmem:[#allocation3 + $0x48] ss:$84 sps:$4 sm:$0xff]  }
 0x1df   :  { %v2708_v22 = vld [vmem:[#allocation3 + $0xec] ss:$84 sps:$4 sm:$0xff]  }
 0x1e0   :  { %2371 = vmatmul.mubr.msk.bf16.vlgmr.msra.gmra.mrb[8].mxu0 %vm157_vm2, %v2992_v8  ;;  %2372 = vmatmul.mubr.msk.bf16.vlgmr.msra.gmra.mrb[8].mxu1 %vm157_vm2, %v2992_v8 }
 0x1e1   :  { %994 = vmatpush1.bf16.msra.mxu0 %v2652_v23  ;;  %1035 = vmatpush1.bf16.msra.mxu1 %v2655_v24  ;;  %v2711_v23 = vld [vmem:[#allocation3 + $0xf4] ss:$84 sps:$4 sm:$0xff]  }
 0x1e2   :  { %995 = vmatprep.subr.bf16.mxu0 %v2660_v25  ;;  %1036 = vmatprep.subr.bf16.mxu1 %v2663_v26  ;;  %v2706_v24 = vld [vmem:[#allocation3 + $0xe8] ss:$84 sps:$4 sm:$0xff]   ;;  %v2709_v25 = vld [vmem:[#allocation3 + $0xf0] ss:$84 sps:$4 sm:$0xff]  }
 0x1e3   :  { %1025 = vmatprep.mubr.bf16.mxu0 %v2761_v35  ;;  %1066 = vmatprep.mubr.bf16.mxu1 %v2761_v35  ;;  %v2714_v26 = vld [vmem:[#allocation3 + $0x194] ss:$84 sps:$4 sm:$0xff]  }
 0x1e5   :  { %996 = vmatpush1.bf16.msra.mxu0 %v2658_v27  ;;  %1037 = vmatpush1.bf16.msra.mxu1 %v2661_v28  ;;  %v2717_v27 = vld [vmem:[#allocation3 + $0x19c] ss:$84 sps:$4 sm:$0xff]  }
 0x1e6   :  { %997 = vmatprep.subr.bf16.mxu0 %v2666_v29  ;;  %1038 = vmatprep.subr.bf16.mxu1 %v2669_v30  ;;  %v2712_v28 = vld [vmem:[#allocation3 + $0x190] ss:$84 sps:$4 sm:$0xff]   ;;  %v2715_v29 = vld [vmem:[#allocation3 + $0x198] ss:$84 sps:$4 sm:$0xff]  }
 0x1e7   :  { %v2720_v30 = vld [vmem:[#allocation3 + $0x23c] ss:$84 sps:$4 sm:$0xff]  }
 0x1e9   :  { %998 = vmatpush1.bf16.msra.mxu0 %v2664_v31  ;;  %1039 = vmatpush1.bf16.msra.mxu1 %v2667_v32  ;;  %v2723_v31 = vld [vmem:[#allocation3 + $0x244] ss:$84 sps:$4 sm:$0xff]  }
 0x1ea   :  { %999 = vmatprep.subr.bf16.mxu0 %v2672_v33  ;;  %1040 = vmatprep.subr.bf16.mxu1 %v2675_v34  ;;  %v2718_v32 = vld [vmem:[#allocation3 + $0x238] ss:$84 sps:$4 sm:$0xff]   ;;  %v2721_v33 = vld [vmem:[#allocation3 + $0x240] ss:$84 sps:$4 sm:$0xff]   ;;  %v2724_v34 = vld [vmem:[#allocation3 + $0x50] ss:$84 sps:$4 sm:$0xff]  }
 0x1ed   :  { %1000 = vmatpush1.bf16.msra.mxu0 %v2670_v62  ;;  %1041 = vmatpush1.bf16.msra.mxu1 %v2673_v63  ;;  %v2726_v62 = vld [vmem:[#allocation3 + $0x1a0] ss:$84 sps:$4 sm:$0xff]   ;;  %v2727_v63 = vld [vmem:[#allocation3 + $0x248] ss:$84 sps:$4 sm:$0xff]  }
 0x1ee   :  { %1075 = vmatprep.subr.bf16.mxu0 %v2678_v1  ;;  %1116 = vmatprep.subr.bf16.mxu1 %v2681_v2  ;;  %v2787_v1 = vmov 8   ;;  %v3496_v2 = vlaneseq }
 0x1ef   :  { %2527 = vset.pattern.permute.xlu1 %v2787_v1 }
 0x1f0   :  { %2373 = vmatmul.mubr.msk.bf16.vlgmr.msra.gmra.mrb[12].mxu0 %vm157_vm2, %v2992_v8  ;;  %2374 = vmatmul.mubr.msk.bf16.vlgmr.msra.gmra.mrb[12].mxu1 %vm157_vm2, %v2992_v8 }
 0x1f1   :  { %1076 = vmatpush1.bf16.msra.mxu0 %v2676_v3  ;;  %1117 = vmatpush1.bf16.msra.mxu1 %v2679_v4  ;;  %v3032_v3 = vshrl.u32 %v3496_v2, 7  ;;  %v2792_v2 = vmov 16  }
 0x1f2   :  { %1077 = vmatprep.subr.bf16.mxu0 %v2684_v5  ;;  %1118 = vmatprep.subr.bf16.mxu1 %v2687_v6  ;;  %v3038_v5 = vld [vmem:[%s3493_s7 + $0x8] sm:$0xff] }
 0x1f3   :  { %1107 = vmatprep.mubr.bf16.mxu0 %v2761_v35  ;;  %1148 = vmatprep.mubr.bf16.mxu1 %v2761_v35  ;;  %v327_v4 = vsub.s32 7, %v3032_v3  ;;  %v3051_v6 = vsub.s32 1, %v3032_v3 }
 0x1f5   :  { %1078 = vmatpush1.bf16.msra.mxu0 %v2682_v7  ;;  %1119 = vmatpush1.bf16.msra.mxu1 %v2685_v9  ;;  %v1332_v9 = vpop.permute.xlu1 %1331 }
 0x1f6   :  { %1079 = vmatprep.subr.bf16.mxu0 %v2690_v10  ;;  %1120 = vmatprep.subr.bf16.mxu1 %v2693_v11 }
 0x1f9   :  { %1080 = vmatpush1.bf16.msra.mxu0 %v2688_v12  ;;  %1121 = vmatpush1.bf16.msra.mxu1 %v2691_v13  ;;  %v1349_v10 = vpop.permute.xlu1 %1348 }
 0x1fa   :  { %1081 = vmatprep.subr.bf16.mxu0 %v2696_v14  ;;  %1122 = vmatprep.subr.bf16.mxu1 %v2699_v15 }
 0x1fd   :  { %1082 = vmatpush1.bf16.msra.mxu0 %v2694_v16  ;;  %1123 = vmatpush1.bf16.msra.mxu1 %v2697_v17  ;;  %v1359_v11 = vpop.permute.xlu1 %1358  ;;  %v1312_v16 = vpop.permute.xlu0 %1311  ;;  %v3060_v17 = vsub.s32 0, %v3032_v3 }
 0x1fe   :  { %1157 = vmatprep.subr.bf16.mxu0 %v2702_v18  ;;  %1198 = vmatprep.subr.bf16.mxu1 %v2705_v19  ;;  %v3065_v18 = vld [vmem:[%s3493_s7] sm:$0xff] }
 0x1ff   :  { %v300_v19 = vrot.slane %v3065_v18, %v3060_v17 }
 0x200   :  { %2375 = vmatmul.mubr.msk.bf16.vlgmr.msra.gmra.mrb[16].mxu0 %vm157_vm2, %v2992_v8  ;;  %2376 = vmatmul.mubr.msk.bf16.vlgmr.msra.gmra.mrb[16].mxu1 %vm157_vm2, %v2992_v8 }
 0x201   :  { %1158 = vmatpush1.bf16.msra.mxu0 %v2700_v20  ;;  %1199 = vmatpush1.bf16.msra.mxu1 %v2703_v21  ;;  %v1386_v12 = vpop.permute.xlu1 %1385  ;;  %v1322_v21 = vpop.permute.xlu0 %1321 }
 0x202   :  { %1159 = vmatprep.subr.bf16.mxu0 %v2708_v22  ;;  %1200 = vmatprep.subr.bf16.mxu1 %v2711_v23 }
 0x203   :  { %1189 = vmatprep.mubr.bf16.mxu0 %v2761_v35  ;;  %1230 = vmatprep.mubr.bf16.mxu1 %v2761_v35  ;;  %v2725_v35 = vld [vmem:[#allocation3 + $0xf8] ss:$84 sps:$4 sm:$0xff]  }
 0x205   :  { %1160 = vmatpush1.bf16.msra.mxu0 %v2706_v24  ;;  %1201 = vmatpush1.bf16.msra.mxu1 %v2709_v25  ;;  %v1396_v13 = vpop.permute.xlu1 %1395 }
 0x206   :  { %1161 = vmatprep.subr.bf16.mxu0 %v2714_v26  ;;  %1202 = vmatprep.subr.bf16.mxu1 %v2717_v27 }
 0x209   :  { %1162 = vmatpush1.bf16.msra.mxu0 %v2712_v28  ;;  %1203 = vmatpush1.bf16.msra.mxu1 %v2715_v29  ;;  %v3055_v14 = vpop.permute.xlu1 %1422  ;;  %v304_v29 = vrot.slane %v3065_v18, %v3051_v6 }
 0x20a   :  { %1163 = vmatprep.subr.bf16.mxu0 %v2720_v30  ;;  %1204 = vmatprep.subr.bf16.mxu1 %v2723_v31 }
 0x20d   :  { %1164 = vmatpush1.bf16.msra.mxu0 %v2718_v32  ;;  %1205 = vmatpush1.bf16.msra.mxu1 %v2721_v33  ;;  %v3057_v15 = vpop.permute.xlu1 %1432 }
 0x20e   :  { %2413 = vmatprep.subr.bf16.mxu0 %v2759_v0 }
 0x210   :  { %2377 = vmatmul.mubr.msk.bf16.vlgmr.msra.gmra.mrb[20].mxu0 %vm157_vm2, %v2992_v8  ;;  %2378 = vmatmul.mubr.msk.bf16.vlgmr.msra.gmra.mrb[20].mxu1 %vm157_vm2, %v2992_v8 }
 0x211   :  { %2414 = vmatpush3.bf16.msra.mxu0 %v2724_v34  ;;  %2421 = vmatprep.mubr.msk.bf16.mxu0 %vm2760_vm0, %v2759_v0  ;;  %v3069_v20 = vpop.permute.xlu1 %1459  ;;  %v3080_v34 = vsub.s32 2, %v3032_v3 }
 0x212   :  { %2415 = vmatprep.subr.bf16.mxu0 %v2759_v0 }
 0x215   :  { %2416 = vmatpush3.bf16.msra.mxu0 %v2725_v35 }
 0x216   :  { %2417 = vmatprep.subr.bf16.mxu0 %v2759_v0 }
 0x219   :  { %2418 = vmatpush3.bf16.msra.mxu0 %v2726_v62 }
 0x21a   :  { %2419 = vmatprep.subr.bf16.mxu0 %v2759_v0  ;;  %v3043_v0 = vrot.slane %v3038_v5, %v327_v4 }
 0x21d   :  { %2420 = vmatpush3.bf16.msra.mxu0 %v2727_v63  ;;  %v3085_v63 = vpop.permute.xlu1 %1469 }
 0x220   :  { %2422 = vmatmul.mubr.msk.bf16.vlgmr.msra.gmra.mrb[24].mxu0 %vm157_vm2, %v2992_v8  ;;  %v3048_v8 = vld [vmem:[%s3493_s7 + $0x10] sm:$0x1f]  ;;  %s2788_s7 = smov 64  }
 0x221   :  { %v368_v7 = vrot.slane %v3048_v8, %v3051_v6 }
 0x2a3   :  { %v863_v22 = vpop.f32.mrb[4].mxu0  ;;  %v904_v23 = vpop.f32.mrb[4].mxu1 }
 0x2a4   :  { %v3071_v24 = vadd.f32 %v863_v22, %v300_v19  ;;  %v865_v25 = vpop.f32.mrb[5].mxu0  ;;  %v906_v26 = vpop.f32.mrb[5].mxu1 }
 0x2a5   :  { %v867_v27 = vpop.f32.mrb[6].mxu0  ;;  %v908_v28 = vpop.f32.mrb[6].mxu1  ;;  %v3082_v35 = vadd.f32 %v865_v25, %v304_v29  ;;  %v3101_v29 = vsub.s32 3, %v3032_v3 }
 0x2a6   :  { %v868_v30 = vpop.f32.mrb[7].mxu0  ;;  %v909_v31 = vpop.f32.mrb[7].mxu1  ;;  %v1324_v32 = vmul.f32 %v1322_v21, %v3071_v24  ;;  %v1314_v33 = vmul.f32 %v1312_v16, %v3071_v24  ;;  %v1334_v62 = vmul.f32 %v1332_v9, %v3071_v24  ;;  %v308_v16 = vrot.slane %v3065_v18, %v3080_v34 }
 0x2a7   :  { %v1369_v19 = vpop.permute.xlu0 %1368  ;;  %v1361_v21 = vmul.f32 %v1359_v11, %v3082_v35  ;;  %v1351_v22 = vmul.f32 %v1349_v10, %v3082_v35  ;;  %v2791_v9 = vmov 12   ;;  %v3096_v25 = vpop.permute.xlu1 %1496 }
 0x2a8   :  { %1326 = vrot.lane.b32.xlu1 %v1324_v32, %s2788_s7  ;;  %1316 = vrot.lane.b32.xlu0 %v1314_v33, %s2789_s21  ;;  %v3098_v28 = vadd.f32 %v904_v23, %v308_v16  ;;  %v1371_v30 = vmul.f32 %v1369_v19, %v3082_v35  ;;  %v312_v23 = vrot.slane %v3065_v18, %v3101_v29 }
 0x2aa   :  { %v1388_v19 = vmul.f32 %v1386_v12, %v3098_v28  ;;  %v3117_v53 = vadd.f32 %v906_v26, %v312_v23  ;;  %v2793_v23 = vmov 20  }
 0x2ab   :  { %v1406_v27 = vpop.permute.xlu0 %1405 }
 0x2ac   :  { %1379 = vperm.xlu1 %2527, %v2934_v36   ;;  %1336 = vrot.lane.b32.xlu0 %v1334_v62, %s2790_s22  ;;  %v1425_v26 = vmul.f32 %v3055_v14, %v3117_v53 }
 0x2b0   :  { %1363 = vrot.lane.b32.xlu1 %v1361_v21, %s2788_s7  ;;  %1353 = vrot.lane.b32.xlu0 %v1351_v22, %s2789_s21  ;;  %v1398_v22 = vmul.f32 %v1396_v13, %v3098_v28  ;;  %v1435_v13 = vmul.f32 %v3057_v15, %v3117_v53  ;;  %v319_v15 = vsub.s32 5, %v3032_v3 }
 0x2b1   :  { %2528 = vset.pattern.permute.xlu1 %v2791_v9 }
 0x2b3   :  { %v945_v11 = vpop.f32.mrb[8].mxu0  ;;  %v3104_v31 = vpop.f32.mrb[8].mxu1 }
 0x2b4   :  { %v947_v10 = vpop.f32.mrb[9].mxu0  ;;  %v3106_v32 = vpop.f32.mrb[9].mxu1  ;;  %1416 = vperm.xlu1 %2528, %v2934_v36   ;;  %1373 = vrot.lane.b32.xlu0 %v1371_v30, %s2790_s22  ;;  %v3120_v30 = vsub.s32 4, %v3032_v3 }
 0x2b5   :  { %v949_v33 = vpop.f32.mrb[10].mxu0  ;;  %v990_v62 = vpop.f32.mrb[10].mxu1 }
 0x2b6   :  { %v950_v16 = vpop.f32.mrb[11].mxu0  ;;  %v991_v21 = vpop.f32.mrb[11].mxu1  ;;  %v1408_v33 = vmul.f32 %v1406_v27, %v3098_v28  ;;  %v316_v12 = vrot.slane %v3065_v18, %v3120_v30  ;;  %v336_v27 = vrot.slane %v3038_v5, %v3051_v6 }
 0x2b7   :  { %v1507_v62 = vpop.permute.xlu1 %1506  ;;  %v1443_v16 = vpop.permute.xlu0 %1442 }
 0x2b8   :  { %1400 = vrot.lane.b32.xlu1 %v1398_v22, %s2788_s7  ;;  %1390 = vrot.lane.b32.xlu0 %v1388_v19, %s2789_s21  ;;  %v1445_v22 = vmul.f32 %v1443_v16, %v3117_v53 }
 0x2b9   :  { %2529 = vset.pattern.permute.xlu1 %v2792_v2 }
 0x2bb   :  { %v1534_v21 = vpop.permute.xlu1 %1533  ;;  %v1480_v19 = vpop.permute.xlu0 %1479 }
 0x2bc   :  { %1453 = vperm.xlu1 %2529, %v2934_v36   ;;  %1410 = vrot.lane.b32.xlu0 %v1408_v33, %s2790_s22  ;;  %v3137_v33 = vadd.f32 %v945_v11, %v316_v12  ;;  %v320_v11 = vrot.slane %v3065_v18, %v319_v15 }
 0x2be   :  { %v1472_v40 = vmul.f32 %v3085_v63, %v3137_v33  ;;  %v1462_v38 = vmul.f32 %v3069_v20, %v3137_v33  ;;  %v348_v63 = vrot.slane %v3038_v5, %v3120_v30 }
 0x2c0   :  { %1437 = vrot.lane.b32.xlu1 %v1435_v13, %s2788_s7  ;;  %1427 = vrot.lane.b32.xlu0 %v1425_v26, %s2789_s21 }
 0x2c1   :  { %2530 = vset.pattern.permute.xlu1 %v2793_v23 }
 0x2c3   :  { %v3140_v49 = vpop.f32.mrb[12].mxu0  ;;  %v3142_v14 = vpop.f32.mrb[12].mxu1 }
 0x2c4   :  { %v1029_v13 = vpop.f32.mrb[13].mxu0  ;;  %v3144_v26 = vpop.f32.mrb[13].mxu1  ;;  %1490 = vperm.xlu1 %2530, %v2934_v36   ;;  %1447 = vrot.lane.b32.xlu0 %v1445_v22, %s2790_s22  ;;  %v1482_v22 = vmul.f32 %v1480_v19, %v3137_v33 }
 0x2c5   :  { %v3148_v46 = vadd.f32 %v1029_v13, %v336_v27  ;;  %v1031_v44 = vpop.f32.mrb[14].mxu0  ;;  %v1072_v16 = vpop.f32.mrb[14].mxu1  ;;  %v3159_v27 = vadd.f32 %v947_v10, %v320_v11  ;;  %v2795_v11 = vmov 28  }
 0x2c6   :  { %v1032_v12 = vpop.f32.mrb[15].mxu0  ;;  %v1073_v42 = vpop.f32.mrb[15].mxu1  ;;  %v323_v44 = vsub.s32 6, %v3032_v3  ;;  %v352_v16 = vrot.slane %v3038_v5, %v319_v15 }
 0x2c7   :  { %v1544_v42 = vpop.permute.xlu1 %1543  ;;  %v1517_v13 = vpop.permute.xlu0 %1516 }
 0x2c8   :  { %1474 = vrot.lane.b32.xlu1 %v1472_v40, %s2788_s7  ;;  %1464 = vrot.lane.b32.xlu0 %v1462_v38, %s2789_s21  ;;  %v324_v20 = vrot.slane %v3065_v18, %v323_v44  ;;  %v1509_v40 = vmul.f32 %v1507_v62, %v3159_v27  ;;  %v1499_v38 = vmul.f32 %v3096_v25, %v3159_v27 }
 0x2c9   :  { %2531 = vset.pattern.permute.xlu1 %v2794_v61  ;;  %v356_v10 = vrot.slane %v3038_v5, %v323_v44  ;;  %v328_v25 = vrot.slane %v3065_v18, %v327_v4 }
 0x2ca   :  { %v3176_v62 = vadd.f32 %v3104_v31, %v324_v20 }
 0x2cb   :  { %v1306_v19 = vpop.permute.xlu1 %1305  ;;  %v1554_v12 = vpop.permute.xlu0 %1553 }
 0x2cc   :  { %1527 = vperm.xlu1 %2531, %v2934_v36   ;;  %1484 = vrot.lane.b32.xlu0 %v1482_v22, %s2790_s22  ;;  %v1519_v22 = vmul.f32 %v1517_v13, %v3159_v27  ;;  %v3194_v13 = vadd.f32 %v3106_v32, %v328_v25 }
 0x2d0   :  { %1511 = vrot.lane.b32.xlu1 %v1509_v40, %s2788_s7  ;;  %1501 = vrot.lane.b32.xlu0 %v1499_v38, %s2789_s21 }
 0x2d1   :  { %2532 = vset.pattern.permute.xlu1 %v2795_v11 }
 0x2d3   :  { %v1109_v40 = vpop.f32.mrb[16].mxu0  ;;  %v1150_v38 = vpop.f32.mrb[16].mxu1 }
 0x2d4   :  { %v3182_v48 = vadd.f32 %v1109_v40, %v348_v63  ;;  %v3184_v44 = vadd.f32 %v1150_v38, %v356_v10  ;;  %v1111_v15 = vpop.f32.mrb[17].mxu0  ;;  %v1152_v60 = vpop.f32.mrb[17].mxu1  ;;  %1564 = vperm.xlu1 %2532, %v2934_v36   ;;  %1521 = vrot.lane.b32.xlu0 %v1519_v22, %s2790_s22  ;;  %v1546_v10 = vmul.f32 %v1544_v42, %v3176_v62 }
 0x2d5   :  { %v3188_v31 = vadd.f32 %v1111_v15, %v352_v16  ;;  %v3191_v3 = vadd.f32 %v1152_v60, %v3043_v0  ;;  %v1113_v4 = vpop.f32.mrb[18].mxu0  ;;  %v1154_v18 = vpop.f32.mrb[18].mxu1  ;;  %v1536_v40 = vmul.f32 %v1534_v21, %v3176_v62  ;;  %v1556_v60 = vmul.f32 %v1554_v12, %v3176_v62 }
 0x2d6   :  { %v1114_v20 = vpop.f32.mrb[19].mxu0  ;;  %v1155_v63 = vpop.f32.mrb[19].mxu1  ;;  %v372_v16 = vrot.slane %v3048_v8, %v3080_v34  ;;  %v376_v12 = vrot.slane %v3048_v8, %v3101_v29 }
 0x2d7   :  { %v1571_v38 = vpop.permute.xlu1 %1570  ;;  %v1581_v0 = vpop.permute.xlu0 %1580 }
 0x2d8   :  { %1548 = vrot.lane.b32.xlu1 %v1546_v10, %s2788_s7  ;;  %1538 = vrot.lane.b32.xlu0 %v1536_v40, %s2789_s21  ;;  %v1573_v36 = vmul.f32 %v1571_v38, %v3194_v13  ;;  %v1583_v42 = vmul.f32 %v1581_v0, %v3194_v13  ;;  %v380_v0 = vrot.slane %v3048_v8, %v3120_v30 }
 0x2d9   :  { %2534 = vset.pattern.permute.xlu1 %v2776_v51  ;;  %v364_v51 = vrot.slane %v3048_v8, %v3060_v17 }
 0x2db   :  { %v1591_v32 = vpop.permute.xlu1 %1590 }
 0x2dc   :  { %1575 = vrot.lane.b32.xlu1 %v1573_v36, %s2789_s21  ;;  %1558 = vrot.lane.b32.xlu0 %v1556_v60, %s2790_s22  ;;  %v1593_v21 = vmul.f32 %v1591_v32, %v3194_v13 }
 0x2df   :  { %v1343_v6 = vpop.permute.xlu1 %1342 }
 0x2e0   :  { %1595 = vrot.lane.b32.xlu1 %v1593_v21, %s2790_s22  ;;  %1585 = vrot.lane.b32.xlu0 %v1583_v42, %s2788_s7 }
 0x2e3   :  { %v1191_v25 = vpop.f32.mrb[20].mxu0  ;;  %v1232_v22 = vpop.f32.mrb[20].mxu1 }
 0x2e4   :  { %v3215_v15 = vadd.f32 %v1191_v25, %v364_v51  ;;  %v3217_v4 = vadd.f32 %v1232_v22, %v372_v16  ;;  %v1193_v18 = vpop.f32.mrb[21].mxu0  ;;  %v1234_v20 = vpop.f32.mrb[21].mxu1  ;;  %v1308_v25 = vmul.f32 %v1306_v19, %v3071_v24 }
 0x2e5   :  { %v3222_v63 = vadd.f32 %v1193_v18, %v368_v7  ;;  %v3224_v10 = vadd.f32 %v1234_v20, %v376_v12  ;;  %v1195_v40 = vpop.f32.mrb[22].mxu0  ;;  %v1236_v38 = vpop.f32.mrb[22].mxu1 }
 0x2e6   :  { %v1196_v36 = vpop.f32.mrb[23].mxu0  ;;  %v1237_v60 = vpop.f32.mrb[23].mxu1  ;;  %v1345_v38 = vmul.f32 %v1343_v6, %v3082_v35 }
 0x2f3   :  { %v1273_v32 = vpop.f32.mrb[24].mxu0 }
 0x2f4   :  { %v3228_v42 = vadd.f32 %v1273_v32, %v380_v0  ;;  %v2423_v21 = vpop.f32.mrb[25].mxu0 }
 0x2f5   :  { %v1276_v51 = vpop.f32.mrb[26].mxu0 }
 0x2f6   :  { %v2424_v16 = vpop.f32.mrb[27].mxu0  ;;  %v1309_v7 = vadd.f32 %v1308_v25, %v3228_v42 }
 0x31a   :  { %v1317_v12 = vpop.permute.xlu0 %1316  ;;  %v1327_v18 = vpop.permute.xlu1 %1326 }
 0x31b   :  { %v1319_v22 = vadd.f32 %v1317_v12, %v1309_v7 }
 0x31d   :  { %v1329_v20 = vadd.f32 %v1327_v18, %v1319_v22 }
 0x31e   :  { %v1337_v40 = vpop.permute.xlu0 %1336 }
 0x31f   :  { %v1339_v36 = vadd.f32 %v1337_v40, %v1329_v20 }
 0x321   :  { %v1346_v8 = vadd.f32 %v1345_v38, %v1339_v36 }
 0x322   :  { %v1354_v30 = vpop.permute.xlu0 %1353 }
 0x323   :  { %v1356_v21 = vadd.f32 %v1354_v30, %v1346_v8 }
 0x326   :  { %v1374_v60 = vpop.permute.xlu0 %1373 }
 0x32a   :  { %v1391_v0 = vpop.permute.xlu0 %1390 }
 0x32b   :  { %v1380_v32 = vpop.permute.xlu1 %1379 }
 0x32c   :  { %v1382_v19 = vmul.f32 %v1380_v32, %v3098_v28 }
 0x32e   :  { %v1411_v51 = vpop.permute.xlu0 %1410 }
 0x32f   :  { %v1364_v16 = vpop.permute.xlu1 %1363 }
 0x330   :  { %v1366_v24 = vadd.f32 %v1364_v16, %v1356_v21 }
 0x332   :  { %v1376_v25 = vadd.f32 %v1374_v60, %v1366_v24  ;;  %v1428_v50 = vpop.permute.xlu0 %1427 }
 0x333   :  { %v1417_v7 = vpop.permute.xlu1 %1416 }
 0x334   :  { %v1383_v12 = vadd.f32 %v1382_v19, %v1376_v25  ;;  %v1419_v6 = vmul.f32 %v1417_v7, %v3117_v53 }
 0x336   :  { %v1448_v22 = vpop.permute.xlu0 %1447  ;;  %v1393_v18 = vadd.f32 %v1391_v0, %v1383_v12 }
 0x337   :  { %v1401_v59 = vpop.permute.xlu1 %1400 }
 0x338   :  { %v1403_v35 = vadd.f32 %v1401_v59, %v1393_v18 }
 0x33a   :  { %v1413_v20 = vadd.f32 %v1411_v51, %v1403_v35  ;;  %v1465_v40 = vpop.permute.xlu0 %1464 }
 0x33b   :  { %v1454_v38 = vpop.permute.xlu1 %1453 }
 0x33c   :  { %v1420_v36 = vadd.f32 %v1419_v6, %v1413_v20  ;;  %v1456_v28 = vmul.f32 %v1454_v38, %v3137_v33 }
 0x33e   :  { %v1430_v8 = vadd.f32 %v1428_v50, %v1420_v36  ;;  %v1485_v21 = vpop.permute.xlu0 %1484 }
 0x33f   :  { %v1438_v30 = vpop.permute.xlu1 %1437 }
 0x340   :  { %v1440_v47 = vadd.f32 %v1438_v30, %v1430_v8 }
 0x342   :  { %v1450_v60 = vadd.f32 %v1448_v22, %v1440_v47  ;;  %v1502_v19 = vpop.permute.xlu0 %1501 }
 0x343   :  { %v1491_v32 = vpop.permute.xlu1 %1490 }
 0x344   :  { %v1457_v16 = vadd.f32 %v1456_v28, %v1450_v60  ;;  %v1493_v59 = vmul.f32 %v1491_v32, %v3159_v27 }
 0x346   :  { %v1467_v24 = vadd.f32 %v1465_v40, %v1457_v16  ;;  %v1522_v12 = vpop.permute.xlu0 %1521 }
 0x347   :  { %v1475_v0 = vpop.permute.xlu1 %1474 }
 0x348   :  { %v1477_v25 = vadd.f32 %v1475_v0, %v1467_v24 }
 0x34a   :  { %v1487_v53 = vadd.f32 %v1485_v21, %v1477_v25  ;;  %v1539_v33 = vpop.permute.xlu0 %1538  ;;  %v3517_v25 = vmov 9  }
 0x34b   :  { %v1528_v51 = vpop.permute.xlu1 %1527 }
 0x34c   :  { %v1494_v7 = vadd.f32 %v1493_v59, %v1487_v53  ;;  %v1530_v6 = vmul.f32 %v1528_v51, %v3176_v62 }
 0x34e   :  { %v1504_v18 = vadd.f32 %v1502_v19, %v1494_v7  ;;  %v1559_v8 = vpop.permute.xlu0 %1558  ;;  %v344_v7 = vrot.slane %v3038_v5, %v3101_v29  ;;  %v3519_v29 = vmov 17  }
 0x34f   :  { %v1512_v50 = vpop.permute.xlu1 %1511 }
 0x350   :  { %v1514_v35 = vadd.f32 %v1512_v50, %v1504_v18  ;;  %v3518_v18 = vmov 13  }
 0x352   :  { %v1524_v20 = vadd.f32 %v1522_v12, %v1514_v35  ;;  %v1586_v32 = vpop.permute.xlu0 %1585  ;;  %v3322_v35 = vadd.f32 %v3144_v26, %v344_v7 }
 0x353   :  { %v1565_v47 = vpop.permute.xlu1 %1564 }
 0x354   :  { %v1531_v22 = vadd.f32 %v1530_v6, %v1524_v20  ;;  %v1567_v30 = vmul.f32 %v1565_v47, %v3194_v13 }
 0x356   :  { %v1541_v38 = vadd.f32 %v1539_v33, %v1531_v22 }
 0x357   :  { %v1549_v40 = vpop.permute.xlu1 %1548 }
 0x358   :  { %v1551_v36 = vadd.f32 %v1549_v40, %v1541_v38 }
 0x35a   :  { %v1561_v27 = vadd.f32 %v1559_v8, %v1551_v36  ;;  %v3520_v36 = vmov 21  }
 0x35b   :  { %v1576_v21 = vpop.permute.xlu1 %1575 }
 0x35c   :  { %v1568_v28 = vadd.f32 %v1567_v30, %v1561_v27 }
 0x35e   :  { %v1578_v60 = vadd.f32 %v1576_v21, %v1568_v28 }
 0x35f   :  { %v1596_v24 = vpop.permute.xlu1 %1595 }
 0x360   :  { %v1588_v16 = vadd.f32 %v1586_v32, %v1578_v60  ;;  %v3521_v32 = vmov 25  }
 0x362   :  { %v1598_v19 = vadd.f32 %v1596_v24, %v1588_v16 }
 0x364   :  { %v3239_v0 = vmax.f32 %v1598_v19, 0.0 }
 0x366   :  { %1619 = vperm.xlu1 %2534, %v3239_v0   ;;  %1603 = vperm.xlu0 %2533, %v3239_v0  }
 0x36a   :  { %2535 = vset.pattern.permute.xlu1 %v2762_v37  ;;  %2536 = vset.pattern.permute.xlu0 %v2782_v57  ;;  %v3510_v37 = vmov 22  }
 0x36b   :  { %1629 = vperm.xlu1 %2535, %v3239_v0   ;;  %1640 = vperm.xlu0 %2536, %v3239_v0  }
 0x36f   :  { %2537 = vset.pattern.permute.xlu1 %v2764_v39  ;;  %2539 = vset.pattern.permute.xlu0 %v2787_v1  ;;  %v3511_v39 = vmov 23  }
 0x370   :  { %1656 = vperm.xlu1 %2537, %v3239_v0   ;;  %1677 = vperm.xlu0 %2539, %v3239_v0  }
 0x374   :  { %2538 = vset.pattern.permute.xlu1 %v2777_v52  ;;  %2542 = vset.pattern.permute.xlu0 %v2791_v9  ;;  %v3515_v52 = vmov 30  }
 0x375   :  { %1666 = vperm.xlu1 %2538, %v3239_v0   ;;  %1714 = vperm.xlu0 %2542, %v3239_v0  }
 0x379   :  { %2540 = vset.pattern.permute.xlu1 %v2766_v41  ;;  %2545 = vset.pattern.permute.xlu0 %v2792_v2  ;;  %v3512_v41 = vmov 26  }
 0x37a   :  { %1693 = vperm.xlu1 %2540, %v3239_v0   ;;  %1751 = vperm.xlu0 %2545, %v3239_v0  }
 0x37e   :  { %2541 = vset.pattern.permute.xlu1 %v2779_v54  ;;  %2548 = vset.pattern.permute.xlu0 %v2793_v23  ;;  %v3516_v54 = vmov 5  }
 0x37f   :  { %1703 = vperm.xlu1 %2541, %v3239_v0   ;;  %1788 = vperm.xlu0 %2548, %v3239_v0  }
 0x383   :  { %2543 = vset.pattern.permute.xlu1 %v2768_v43  ;;  %2551 = vset.pattern.permute.xlu0 %v2794_v61  ;;  %v3513_v43 = vmov 27  }
 0x384   :  { %1730 = vperm.xlu1 %2543, %v3239_v0   ;;  %1825 = vperm.xlu0 %2551, %v3239_v0  }
 0x388   :  { %2544 = vset.pattern.permute.xlu1 %v2781_v56  ;;  %2554 = vset.pattern.permute.xlu0 %v2795_v11 }
 0x389   :  { %1740 = vperm.xlu1 %2544, %v3239_v0   ;;  %1862 = vperm.xlu0 %2554, %v3239_v0  }
 0x38d   :  { %2546 = vset.pattern.permute.xlu1 %v2770_v45  ;;  %2557 = vset.pattern.permute.xlu0 %v2780_v55  ;;  %v3514_v45 = vmov 1   ;;  %v332_v55 = vrot.slane %v3038_v5, %v3060_v17 }
 0x38e   :  { %1767 = vperm.xlu1 %2546, %v3239_v0   ;;  %1888 = vperm.xlu0 %2557, %v3239_v0  }
 0x38f   :  { %v3293_v56 = vadd.f32 %v3140_v49, %v332_v55  ;;  %v340_v49 = vrot.slane %v3038_v5, %v3080_v34 }
 0x391   :  { %v3309_v59 = vadd.f32 %v3142_v14, %v340_v49  ;;  %v2797_v49 = vmov 32  }
 0x392   :  { %2547 = vset.pattern.permute.xlu1 %v2783_v58 }
 0x393   :  { %1777 = vperm.xlu1 %2547, %v3239_v0  }
 0x397   :  { %2549 = vset.pattern.permute.xlu1 %v3510_v37 }
 0x398   :  { %1804 = vperm.xlu1 %2549, %v3239_v0  }
 0x39c   :  { %2550 = vset.pattern.permute.xlu1 %v3511_v39 }
 0x39d   :  { %1814 = vperm.xlu1 %2550, %v3239_v0  }
 0x3a1   :  { %2552 = vset.pattern.permute.xlu1 %v3512_v41 }
 0x3a2   :  { %1841 = vperm.xlu1 %2552, %v3239_v0  }
 0x3a6   :  { %2553 = vset.pattern.permute.xlu1 %v3513_v43  ;;  %v3522_v43 = vmov 29  }
 0x3a7   :  { %1851 = vperm.xlu1 %2553, %v3239_v0  }
 0x3ab   :  { %2555 = vset.pattern.permute.xlu1 %v3514_v45 }
 0x3ac   :  { %1613 = vperm.xlu1 %2555, %v3239_v0  }
 0x3b0   :  { %2556 = vset.pattern.permute.xlu1 %v3515_v52 }
 0x3b1   :  { %1878 = vperm.xlu1 %2556, %v3239_v0  }
 0x3b5   :  { %2558 = vset.pattern.permute.xlu1 %v3516_v54 }
 0x3e5   :  { %v1620_v57 = vpop.permute.xlu1 %1619  ;;  %v1604_v58 = vpop.permute.xlu0 %1603 }
 0x3e6   :  { %v1622_v61 = vmul.f32 %v1620_v57, %v3293_v56  ;;  %v1606_v1 = vmul.f32 %v1604_v58, %v3293_v56 }
 0x3e8   :  { %1624 = vrot.lane.b32.xlu0 %v1622_v61, %s2789_s21  ;;  %1608 = vrot.lane.b32.xlu1 %v1606_v1, %s2790_s22 }
 0x3ea   :  { %v1630_v2 = vpop.permute.xlu1 %1629  ;;  %v1641_v9 = vpop.permute.xlu0 %1640 }
 0x3eb   :  { %v1643_v23 = vmul.f32 %v1641_v9, %v3148_v46  ;;  %v1632_v17 = vmul.f32 %v1630_v2, %v3293_v56 }
 0x3ec   :  { %1650 = vperm.xlu1 %2558, %v3239_v0  }
 0x3ed   :  { %1645 = vrot.lane.b32.xlu0 %v1643_v23, %s2790_s22  ;;  %v2796_v23 = vmov 33  }
 0x3ee   :  { %2566 = vset.pattern.permute.xlu0 %v2796_v23 }
 0x3ef   :  { %v1657_v11 = vpop.permute.xlu1 %1656  ;;  %v1678_v13 = vpop.permute.xlu0 %1677 }
 0x3f0   :  { %v1659_v62 = vmul.f32 %v1657_v11, %v3148_v46  ;;  %1634 = vrot.lane.b32.xlu1 %v1632_v17, %s2788_s7  ;;  %v1680_v53 = vmul.f32 %v1678_v13, %v3309_v59 }
 0x3f1   :  { %2559 = vset.pattern.permute.xlu1 %v3517_v25 }
 0x3f2   :  { %1661 = vrot.lane.b32.xlu0 %v1659_v62, %s2789_s21 }
 0x3f4   :  { %v1667_v51 = vpop.permute.xlu1 %1666  ;;  %1687 = vperm.xlu1 %2559, %v3239_v0   ;;  %v1715_v50 = vpop.permute.xlu0 %1714 }
 0x3f5   :  { %v1669_v34 = vmul.f32 %v1667_v51, %v3148_v46  ;;  %v1717_v6 = vmul.f32 %v1715_v50, %v3322_v35 }
 0x3f6   :  { %1682 = vrot.lane.b32.xlu0 %v1680_v53, %s2790_s22 }
 0x3f8   :  { %1671 = vrot.lane.b32.xlu1 %v1669_v34, %s2788_s7 }
 0x3f9   :  { %v1694_v12 = vpop.permute.xlu1 %1693  ;;  %2560 = vset.pattern.permute.xlu1 %v3518_v18  ;;  %v1752_v26 = vpop.permute.xlu0 %1751 }
 0x3fa   :  { %v1696_v14 = vmul.f32 %v1694_v12, %v3309_v59  ;;  %v1754_v22 = vmul.f32 %v1752_v26, %v3182_v48 }
 0x3fc   :  { %1724 = vperm.xlu1 %2560, %v3239_v0   ;;  %1698 = vrot.lane.b32.xlu0 %v1696_v14, %s2789_s21 }
 0x3fe   :  { %v1704_v20 = vpop.permute.xlu1 %1703  ;;  %v1789_v27 = vpop.permute.xlu0 %1788 }
 0x3ff   :  { %v1706_v5 = vmul.f32 %v1704_v20, %v3309_v59  ;;  %v1791_v21 = vmul.f32 %v1789_v27, %v3188_v31 }
 0x400   :  { %1719 = vrot.lane.b32.xlu0 %v1717_v6, %s2790_s22  ;;  %2561 = vset.pattern.permute.xlu1 %v3519_v29 }
 0x401   :  { %1708 = vrot.lane.b32.xlu1 %v1706_v5, %s2788_s7 }
 0x403   :  { %v1731_v33 = vpop.permute.xlu1 %1730  ;;  %v1826_v19 = vpop.permute.xlu0 %1825 }
 0x404   :  { %v1733_v47 = vmul.f32 %v1731_v33, %v3322_v35  ;;  %v1828_v37 = vmul.f32 %v1826_v19, %v3184_v44 }
 0x405   :  { %1761 = vperm.xlu1 %2561, %v3239_v0  }
 0x406   :  { %1735 = vrot.lane.b32.xlu0 %v1733_v47, %s2789_s21 }
 0x408   :  { %v1741_v38 = vpop.permute.xlu1 %1740  ;;  %v1863_v45 = vpop.permute.xlu0 %1862 }
 0x409   :  { %v1743_v40 = vmul.f32 %v1741_v38, %v3322_v35  ;;  %2562 = vset.pattern.permute.xlu1 %v3520_v36  ;;  %v1865_v55 = vmul.f32 %v1863_v45, %v3191_v3 }
 0x40a   :  { %1756 = vrot.lane.b32.xlu0 %v1754_v22, %s2790_s22 }
 0x40b   :  { %1745 = vrot.lane.b32.xlu1 %v1743_v40, %s2788_s7 }
 0x40d   :  { %v1768_v8 = vpop.permute.xlu1 %1767  ;;  %v1889_v58 = vpop.permute.xlu0 %1888 }
 0x40e   :  { %v1770_v30 = vmul.f32 %v1768_v8, %v3182_v48  ;;  %v1891_v1 = vmul.f32 %v1889_v58, %v3191_v3 }
 0x40f   :  { %1798 = vperm.xlu1 %2562, %v3239_v0  }
 0x410   :  { %1772 = vrot.lane.b32.xlu0 %v1770_v30, %s2789_s21 }
 0x412   :  { %v1778_v28 = vpop.permute.xlu1 %1777 }
 0x413   :  { %v1780_v60 = vmul.f32 %v1778_v28, %v3182_v48  ;;  %2563 = vset.pattern.permute.xlu1 %v3521_v32 }
 0x414   :  { %1793 = vrot.lane.b32.xlu0 %v1791_v21, %s2790_s22 }
 0x415   :  { %1782 = vrot.lane.b32.xlu1 %v1780_v60, %s2788_s7 }
 0x417   :  { %v1805_v16 = vpop.permute.xlu1 %1804 }
 0x418   :  { %v1807_v24 = vmul.f32 %v1805_v16, %v3188_v31 }
 0x419   :  { %1835 = vperm.xlu1 %2563, %v3239_v0  }
 0x41a   :  { %1809 = vrot.lane.b32.xlu0 %v1807_v24, %s2789_s21 }
 0x41c   :  { %v1815_v39 = vpop.permute.xlu1 %1814 }
 0x41d   :  { %v1817_v41 = vmul.f32 %v1815_v39, %v3188_v31  ;;  %2564 = vset.pattern.permute.xlu1 %v3522_v43 }
 0x41e   :  { %1830 = vrot.lane.b32.xlu0 %v1828_v37, %s2790_s22 }
 0x41f   :  { %1819 = vrot.lane.b32.xlu1 %v1817_v41, %s2788_s7 }
 0x421   :  { %v1842_v52 = vpop.permute.xlu1 %1841 }
 0x422   :  { %v1844_v54 = vmul.f32 %v1842_v52, %v3184_v44 }
 0x423   :  { %1872 = vperm.xlu1 %2564, %v3239_v0  }
 0x424   :  { %1846 = vrot.lane.b32.xlu0 %v1844_v54, %s2789_s21 }
 0x426   :  { %v1852_v57 = vpop.permute.xlu1 %1851 }
 0x427   :  { %v1854_v61 = vmul.f32 %v1852_v57, %v3184_v44  ;;  %2565 = vset.pattern.permute.xlu1 %v2797_v49 }
 0x428   :  { %1867 = vrot.lane.b32.xlu0 %v1865_v55, %s2790_s22 }
 0x429   :  { %1856 = vrot.lane.b32.xlu1 %v1854_v61, %s2788_s7 }
 0x42b   :  { %v1614_v2 = vpop.permute.xlu1 %1613 }
 0x42c   :  { %1893 = vrot.lane.b32.xlu0 %v1891_v1, %s2788_s7  ;;  %v1616_v13 = vmul.f32 %v1614_v2, %v3293_v56 }
 0x430   :  { %v1879_v9 = vpop.permute.xlu1 %1878 }
 0x431   :  { %v1881_v0 = vmul.f32 %v1879_v9, %v3191_v3 }
 0x433   :  { %1883 = vrot.lane.b32.xlu1 %v1881_v0, %s2789_s21 }
 0x45a   :  { %v1609_v17 = vpop.permute.xlu1 %1608  ;;  %v1625_v11 = vpop.permute.xlu0 %1624 }
 0x45b   :  { %v1611_v62 = vadd.f32 %v1609_v17, %v3228_v42 }
 0x45d   :  { %v1617_v25 = vadd.f32 %v1616_v13, %v1611_v62 }
 0x45f   :  { %v1646_v53 = vpop.permute.xlu0 %1645  ;;  %v1627_v34 = vadd.f32 %v1625_v11, %v1617_v25 }
 0x464   :  { %v1662_v12 = vpop.permute.xlu0 %1661 }
 0x468   :  { %v1683_v5 = vpop.permute.xlu0 %1682 }
 0x46b   :  { %v1651_v51 = vpop.permute.xlu1 %1650 }
 0x46c   :  { %v1653_v14 = vmul.f32 %v1651_v51, %v3148_v46 }
 0x46e   :  { %v1699_v26 = vpop.permute.xlu0 %1698 }
 0x46f   :  { %v1635_v7 = vpop.permute.xlu1 %1634 }
 0x470   :  { %v1637_v18 = vadd.f32 %v1635_v7, %v1627_v34 }
 0x472   :  { %v1648_v50 = vadd.f32 %v1646_v53, %v1637_v18  ;;  %v1720_v30 = vpop.permute.xlu0 %1719 }
 0x473   :  { %v1688_v6 = vpop.permute.xlu1 %1687 }
 0x474   :  { %v1654_v20 = vadd.f32 %v1653_v14, %v1648_v50  ;;  %v1690_v22 = vmul.f32 %v1688_v6, %v3309_v59 }
 0x476   :  { %v1664_v29 = vadd.f32 %v1662_v12, %v1654_v20 }
 0x477   :  { %v1672_v33 = vpop.permute.xlu1 %1671 }
 0x478   :  { %v1674_v47 = vadd.f32 %v1672_v33, %v1664_v29  ;;  %v1736_v28 = vpop.permute.xlu0 %1735  ;;  %v2801_v29 = vmov 35   ;;  %v2802_v33 = vmov 43  }
 0x47a   :  { %v1685_v56 = vadd.f32 %v1683_v5, %v1674_v47  ;;  %v2799_v5 = vmov 34   ;;  %v2803_v47 = vmov 38  }
 0x47b   :  { %v1725_v38 = vpop.permute.xlu1 %1724 }
 0x47c   :  { %v1691_v40 = vadd.f32 %v1690_v22, %v1685_v56  ;;  %v1727_v21 = vmul.f32 %v1725_v38, %v3322_v35  ;;  %v1757_v37 = vpop.permute.xlu0 %1756  ;;  %v2805_v22 = vmov 39   ;;  %v2806_v56 = vmov 50  }
 0x47d   :  { %v2807_v38 = vmov 41  }
 0x47e   :  { %v1701_v36 = vadd.f32 %v1699_v26, %v1691_v40  ;;  %v2804_v26 = vmov 47   ;;  %v2808_v40 = vmov 54  }
 0x47f   :  { %v1709_v8 = vpop.permute.xlu1 %1708 }
 0x480   :  { %v1711_v27 = vadd.f32 %v1709_v8, %v1701_v36  ;;  %v2809_v36 = vmov 42   ;;  %v2810_v8 = vmov 57  }
 0x482   :  { %v1722_v46 = vadd.f32 %v1720_v30, %v1711_v27  ;;  %v1773_v43 = vpop.permute.xlu0 %1772  ;;  %v2811_v30 = vmov 45   ;;  %v2812_v27 = vmov 61  }
 0x484   :  { %v1762_v60 = vpop.permute.xlu1 %1761  ;;  %v1728_v32 = vadd.f32 %v1727_v21, %v1722_v46  ;;  %v2813_v21 = vmov 46   ;;  %v2814_v46 = vmov 36  }
 0x485   :  { %v1764_v39 = vmul.f32 %v1762_v60, %v3182_v48  ;;  %v2816_v60 = vmov 49  }
 0x486   :  { %v1738_v16 = vadd.f32 %v1736_v28, %v1728_v32  ;;  %v1794_v57 = vpop.permute.xlu0 %1793  ;;  %v2815_v28 = vmov 48   ;;  %v2817_v32 = vmov 63  }
 0x488   :  { %v1746_v24 = vpop.permute.xlu1 %1745 }
 0x489   :  { %v1748_v19 = vadd.f32 %v1746_v24, %v1738_v16  ;;  %v2818_v16 = vmov 51   ;;  %v2819_v24 = vmov 53  }
 0x48b   :  { %v1759_v59 = vadd.f32 %v1757_v37, %v1748_v19  ;;  %v2820_v19 = vmov 55   ;;  %v2821_v37 = vmov 56  }
 0x48c   :  { %v1810_v1 = vpop.permute.xlu0 %1809 }
 0x48d   :  { %v1765_v41 = vadd.f32 %v1764_v39, %v1759_v59  ;;  %v2822_v39 = vmov 58   ;;  %v2823_v59 = vmov 59  }
 0x48e   :  { %v1799_v45 = vpop.permute.xlu1 %1798 }
 0x48f   :  { %v1775_v52 = vadd.f32 %v1773_v43, %v1765_v41  ;;  %v1801_v35 = vmul.f32 %v1799_v45, %v3188_v31  ;;  %v2824_v41 = vmov 62   ;;  %v2825_v43 = vmov 44  }
 0x490   :  { %v1831_v49 = vpop.permute.xlu0 %1830 }
 0x492   :  { %v1783_v54 = vpop.permute.xlu1 %1782 }
 0x493   :  { %v1785_v55 = vadd.f32 %v1783_v54, %v1775_v52 }
 0x495   :  { %v1796_v58 = vadd.f32 %v1794_v57, %v1785_v55 }
 0x496   :  { %v1847_v62 = vpop.permute.xlu0 %1846 }
 0x497   :  { %v1802_v61 = vadd.f32 %v1801_v35, %v1796_v58 }
 0x498   :  { %v1836_v2 = vpop.permute.xlu1 %1835 }
 0x499   :  { %v1812_v9 = vadd.f32 %v1810_v1, %v1802_v61  ;;  %v1838_v48 = vmul.f32 %v1836_v2, %v3184_v44  ;;  %v2798_v44 = vmov 37  }
 0x49a   :  { %v1868_v34 = vpop.permute.xlu0 %1867 }
 0x49c   :  { %v1820_v0 = vpop.permute.xlu1 %1819 }
 0x49d   :  { %v1822_v23 = vadd.f32 %v1820_v0, %v1812_v9 }
 0x49e   :  { %v1894_v50 = vpop.permute.xlu0 %1893 }
 0x49f   :  { %v1833_v17 = vadd.f32 %v1831_v49, %v1822_v23 }
 0x4a1   :  { %v1839_v11 = vadd.f32 %v1838_v48, %v1833_v17 }
 0x4a2   :  { %v1873_v13 = vpop.permute.xlu1 %1872 }
 0x4a3   :  { %v1849_v25 = vadd.f32 %v1847_v62, %v1839_v11  ;;  %v1875_v31 = vmul.f32 %v1873_v13, %v3191_v3  ;;  %v2800_v3 = vmov 40   ;;  %v2830_v13 = vmov 52  }
 0x4a6   :  { %v1857_v53 = vpop.permute.xlu1 %1856 }
 0x4a7   :  { %v1859_v51 = vadd.f32 %v1857_v53, %v1849_v25 }
 0x4a9   :  { %v1870_v7 = vadd.f32 %v1868_v34, %v1859_v51 }
 0x4aa   :  { %v1884_v18 = vpop.permute.xlu1 %1883 }
 0x4ab   :  { %v1876_v12 = vadd.f32 %v1875_v31, %v1870_v7 }
 0x4ad   :  { %v1886_v14 = vadd.f32 %v1884_v18, %v1876_v12 }
 0x4af   :  { %v1896_v6 = vadd.f32 %v1894_v50, %v1886_v14 }
 0x4b1   :  { %v3375_v20 = vmax.f32 %v1896_v6, 0.0 }
 0x4b3   :  { %1911 = vperm.xlu0 %2566, %v3375_v20   ;;  %1901 = vperm.xlu1 %2565, %v3375_v20  }
 0x4b7   :  { %2569 = vset.pattern.permute.xlu0 %v2798_v44  ;;  %2567 = vset.pattern.permute.xlu1 %v2799_v5 }
 0x4b8   :  { %1947 = vperm.xlu0 %2569, %v3375_v20   ;;  %1921 = vperm.xlu1 %2567, %v3375_v20  }
 0x4bc   :  { %2572 = vset.pattern.permute.xlu0 %v2800_v3  ;;  %2568 = vset.pattern.permute.xlu1 %v2801_v29 }
 0x4bd   :  { %1978 = vperm.xlu0 %2572, %v3375_v20   ;;  %1931 = vperm.xlu1 %2568, %v3375_v20  }
 0x4c1   :  { %2575 = vset.pattern.permute.xlu0 %v2802_v33  ;;  %2570 = vset.pattern.permute.xlu1 %v2803_v47  ;;  %v2831_v47 = vmov 60  }
 0x4c2   :  { %2008 = vperm.xlu0 %2575, %v3375_v20   ;;  %1957 = vperm.xlu1 %2570, %v3375_v20  }
 0x4c6   :  { %2578 = vset.pattern.permute.xlu0 %v2804_v26  ;;  %2571 = vset.pattern.permute.xlu1 %v2805_v22 }
 0x4c7   :  { %2044 = vperm.xlu0 %2578, %v3375_v20   ;;  %1967 = vperm.xlu1 %2571, %v3375_v20  }
 0x4cb   :  { %2581 = vset.pattern.permute.xlu0 %v2806_v56  ;;  %2573 = vset.pattern.permute.xlu1 %v2807_v38 }
 0x4cc   :  { %2075 = vperm.xlu0 %2581, %v3375_v20   ;;  %1988 = vperm.xlu1 %2573, %v3375_v20  }
 0x4d0   :  { %2584 = vset.pattern.permute.xlu0 %v2808_v40  ;;  %2574 = vset.pattern.permute.xlu1 %v2809_v36 }
 0x4d1   :  { %2111 = vperm.xlu0 %2584, %v3375_v20   ;;  %1998 = vperm.xlu1 %2574, %v3375_v20  }
 0x4d5   :  { %2587 = vset.pattern.permute.xlu0 %v2810_v8  ;;  %2576 = vset.pattern.permute.xlu1 %v2811_v30 }
 0x4d6   :  { %2142 = vperm.xlu0 %2587, %v3375_v20   ;;  %2024 = vperm.xlu1 %2576, %v3375_v20  }
 0x4da   :  { %2590 = vset.pattern.permute.xlu0 %v2812_v27  ;;  %2577 = vset.pattern.permute.xlu1 %v2813_v21 }
 0x4db   :  { %2178 = vperm.xlu0 %2590, %v3375_v20   ;;  %2034 = vperm.xlu1 %2577, %v3375_v20  }
 0x4df   :  { %2593 = vset.pattern.permute.xlu0 %v2814_v46  ;;  %2579 = vset.pattern.permute.xlu1 %v2815_v28 }
 0x4e0   :  { %1941 = vperm.xlu0 %2593, %v3375_v20   ;;  %2055 = vperm.xlu1 %2579, %v3375_v20  }
 0x4e4   :  { %2580 = vset.pattern.permute.xlu1 %v2816_v60  ;;  %2597 = vset.pattern.permute.xlu0 %v2817_v32 }
 0x4e5   :  { %2065 = vperm.xlu1 %2580, %v3375_v20  }
 0x4e9   :  { %2582 = vset.pattern.permute.xlu1 %v2818_v16 }
 0x4ea   :  { %2085 = vperm.xlu1 %2582, %v3375_v20  }
 0x4ee   :  { %2583 = vset.pattern.permute.xlu1 %v2819_v24 }
 0x4ef   :  { %2101 = vperm.xlu1 %2583, %v3375_v20  }
 0x4f3   :  { %2585 = vset.pattern.permute.xlu1 %v2820_v19 }
 0x4f4   :  { %2121 = vperm.xlu1 %2585, %v3375_v20  }
 0x4f8   :  { %2586 = vset.pattern.permute.xlu1 %v2821_v37 }
 0x4f9   :  { %2132 = vperm.xlu1 %2586, %v3375_v20  }
 0x4fd   :  { %2588 = vset.pattern.permute.xlu1 %v2822_v39 }
 0x4fe   :  { %2152 = vperm.xlu1 %2588, %v3375_v20  }
 0x502   :  { %2589 = vset.pattern.permute.xlu1 %v2823_v59 }
 0x503   :  { %2162 = vperm.xlu1 %2589, %v3375_v20  }
 0x507   :  { %2591 = vset.pattern.permute.xlu1 %v2824_v41 }
 0x508   :  { %2188 = vperm.xlu1 %2591, %v3375_v20  }
 0x50c   :  { %2592 = vset.pattern.permute.xlu1 %v2817_v32 }
 0x50d   :  { %2198 = vperm.xlu1 %2592, %v3375_v20  }
 0x511   :  { %2594 = vset.pattern.permute.xlu1 %v2825_v43  ;;  %v2225_v43 = vld [vmem:[%s3486_s0] sm:$0xff] }
 0x532   :  { %v1902_v45 = vpop.permute.xlu1 %1901  ;;  %v1912_v52 = vpop.permute.xlu0 %1911 }
 0x533   :  { %v1904_v54 = vmul.f32 %v1902_v45, %v3215_v15  ;;  %v1914_v55 = vmul.f32 %v1912_v52, %v3215_v15 }
 0x535   :  { %1906 = vrot.lane.b32.xlu1 %v1904_v54, %s2788_s7 }
 0x537   :  { %v1922_v57 = vpop.permute.xlu1 %1921  ;;  %v1948_v58 = vpop.permute.xlu0 %1947 }
 0x538   :  { %v1924_v35 = vmul.f32 %v1922_v57, %v3215_v15  ;;  %v1950_v61 = vmul.f32 %v1948_v58, %v3215_v15 }
 0x539   :  { %1916 = vrot.lane.b32.xlu1 %v1914_v55, %s2826_s23 }
 0x53a   :  { %1926 = vrot.lane.b32.xlu0 %v1924_v35, %s2790_s22 }
 0x53c   :  { %v1932_v1 = vpop.permute.xlu1 %1931  ;;  %v1979_v49 = vpop.permute.xlu0 %1978 }
 0x53d   :  { %v1934_v2 = vmul.f32 %v1932_v1, %v3215_v15  ;;  %v1981_v17 = vmul.f32 %v1979_v49, %v3222_v63 }
 0x53e   :  { %1952 = vrot.lane.b32.xlu0 %v1950_v61, %s2827_s24 }
 0x53f   :  { %1936 = vrot.lane.b32.xlu1 %v1934_v2, %s2828_s25 }
 0x541   :  { %v1958_v9 = vpop.permute.xlu1 %1957  ;;  %v2009_v25 = vpop.permute.xlu0 %2008 }
 0x542   :  { %v1960_v0 = vmul.f32 %v1958_v9, %v3215_v15  ;;  %v2011_v53 = vmul.f32 %v2009_v25, %v3222_v63 }
 0x544   :  { %1962 = vrot.lane.b32.xlu1 %v1960_v0, %s2789_s21 }
 0x546   :  { %v1968_v23 = vpop.permute.xlu1 %1967  ;;  %v2045_v12 = vpop.permute.xlu0 %2044 }
 0x547   :  { %v1970_v48 = vmul.f32 %v1968_v23, %v3215_v15  ;;  %v2047_v18 = vmul.f32 %v2045_v12, %v3222_v63 }
 0x548   :  { %2018 = vperm.xlu1 %2594, %v3375_v20  }
 0x549   :  { %1972 = vrot.lane.b32.xlu0 %v1970_v48, %s2829_s6 }
 0x54b   :  { %v1989_v11 = vpop.permute.xlu1 %1988  ;;  %v2076_v5 = vpop.permute.xlu0 %2075 }
 0x54c   :  { %v1991_v62 = vmul.f32 %v1989_v11, %v3222_v63  ;;  %2595 = vset.pattern.permute.xlu1 %v2830_v13  ;;  %v2078_v3 = vmul.f32 %v2076_v5, %v3217_v4 }
 0x54d   :  { %1983 = vrot.lane.b32.xlu0 %v1981_v17, %s2788_s7 }
 0x54e   :  { %1993 = vrot.lane.b32.xlu1 %v1991_v62, %s2826_s23 }
 0x550   :  { %v1999_v51 = vpop.permute.xlu1 %1998  ;;  %v2112_v56 = vpop.permute.xlu0 %2111 }
 0x551   :  { %v2001_v34 = vmul.f32 %v1999_v51, %v3222_v63  ;;  %v2114_v38 = vmul.f32 %v2112_v56, %v3217_v4 }
 0x552   :  { %2013 = vrot.lane.b32.xlu1 %v2011_v53, %s2828_s25 }
 0x553   :  { %2003 = vrot.lane.b32.xlu0 %v2001_v34, %s2790_s22 }
 0x555   :  { %v2025_v31 = vpop.permute.xlu1 %2024  ;;  %v2143_v8 = vpop.permute.xlu0 %2142 }
 0x556   :  { %v2027_v7 = vmul.f32 %v2025_v31, %v3222_v63  ;;  %v2145_v21 = vmul.f32 %v2143_v8, %v3224_v10 }
 0x558   :  { %2029 = vrot.lane.b32.xlu0 %v2027_v7, %s2827_s24 }
 0x55a   :  { %v2035_v14 = vpop.permute.xlu1 %2034  ;;  %v2179_v16 = vpop.permute.xlu0 %2178 }
 0x55b   :  { %v2037_v50 = vmul.f32 %v2035_v14, %v3222_v63  ;;  %v2181_v24 = vmul.f32 %v2179_v16, %v3224_v10 }
 0x55c   :  { %2049 = vrot.lane.b32.xlu0 %v2047_v18, %s2829_s6 }
 0x55d   :  { %2039 = vrot.lane.b32.xlu1 %v2037_v50, %s2789_s21 }
 0x55f   :  { %v2056_v6 = vpop.permute.xlu1 %2055  ;;  %v1942_v52 = vpop.permute.xlu0 %1941 }
 0x560   :  { %v2058_v44 = vmul.f32 %v2056_v6, %v3217_v4  ;;  %v1944_v2 = vmul.f32 %v1942_v52, %v3215_v15 }
 0x561   :  { %2095 = vperm.xlu1 %2595, %v3375_v20  }
 0x562   :  { %2060 = vrot.lane.b32.xlu0 %v2058_v44, %s2788_s7 }
 0x564   :  { %v2066_v29 = vpop.permute.xlu1 %2065 }
 0x565   :  { %v2068_v33 = vmul.f32 %v2066_v29, %v3217_v4  ;;  %2596 = vset.pattern.permute.xlu1 %v2831_v47 }
 0x566   :  { %2080 = vrot.lane.b32.xlu0 %v2078_v3, %s2790_s22 }
 0x567   :  { %2070 = vrot.lane.b32.xlu1 %v2068_v33, %s2826_s23 }
 0x569   :  { %v2086_v26 = vpop.permute.xlu1 %2085 }
 0x56a   :  { %v2088_v22 = vmul.f32 %v2086_v26, %v3217_v4 }
 0x56c   :  { %2090 = vrot.lane.b32.xlu1 %v2088_v22, %s2828_s25 }
 0x56e   :  { %v2102_v40 = vpop.permute.xlu1 %2101 }
 0x56f   :  { %v2104_v36 = vmul.f32 %v2102_v40, %v3217_v4 }
 0x570   :  { %2116 = vrot.lane.b32.xlu1 %v2114_v38, %s2789_s21 }
 0x571   :  { %2106 = vrot.lane.b32.xlu0 %v2104_v36, %s2827_s24 }
 0x573   :  { %v2122_v30 = vpop.permute.xlu1 %2121 }
 0x574   :  { %v2124_v27 = vmul.f32 %v2122_v30, %v3217_v4  ;;  %2172 = vperm.xlu1 %2596, %v3375_v20  }
 0x576   :  { %2126 = vrot.lane.b32.xlu0 %v2124_v27, %s2829_s6 }
 0x578   :  { %2147 = vrot.lane.b32.xlu1 %v2145_v21, %s2826_s23  ;;  %v2133_v46 = vpop.permute.xlu1 %2132 }
 0x579   :  { %v2135_v28 = vmul.f32 %v2133_v46, %v3224_v10 }
 0x57b   :  { %2137 = vrot.lane.b32.xlu0 %v2135_v28, %s2788_s7 }
 0x57d   :  { %v2153_v60 = vpop.permute.xlu1 %2152 }
 0x57e   :  { %v2155_v32 = vmul.f32 %v2153_v60, %v3224_v10 }
 0x580   :  { %2157 = vrot.lane.b32.xlu0 %v2155_v32, %s2790_s22 }
 0x582   :  { %v2163_v20 = vpop.permute.xlu1 %2162 }
 0x583   :  { %v2165_v19 = vmul.f32 %v2163_v20, %v3224_v10 }
 0x584   :  { %2183 = vrot.lane.b32.xlu0 %v2181_v24, %s2827_s24 }
 0x585   :  { %2167 = vrot.lane.b32.xlu1 %v2165_v19, %s2828_s25 }
 0x587   :  { %v2189_v37 = vpop.permute.xlu1 %2188 }
 0x588   :  { %v2191_v39 = vmul.f32 %v2189_v37, %v3224_v10 }
 0x58a   :  { %2193 = vrot.lane.b32.xlu1 %v2191_v39, %s2789_s21 }
 0x58c   :  { %v2199_v59 = vpop.permute.xlu1 %2198 }
 0x58d   :  { %v2201_v41 = vmul.f32 %v2199_v59, %v3224_v10 }
 0x58f   :  { %2203 = vrot.lane.b32.xlu0 %v2201_v41, %s2829_s6 }
 0x593   :  { %2227 = vrot.lane.b32.xlu0 %v2225_v43, %s2788_s7 }
 0x5a7   :  { %v1907_v45 = vpop.permute.xlu1 %1906 }
 0x5a8   :  { %v1909_v55 = vadd.f32 %v1907_v45, %v3228_v42 }
 0x5ab   :  { %v1917_v54 = vpop.permute.xlu1 %1916 }
 0x5ac   :  { %v1919_v57 = vadd.f32 %v1917_v54, %v1909_v55  ;;  %v1927_v35 = vpop.permute.xlu0 %1926 }
 0x5ae   :  { %v1929_v61 = vadd.f32 %v1927_v35, %v1919_v57 }
 0x5b0   :  { %v1953_v9 = vpop.permute.xlu0 %1952 }
 0x5b1   :  { %v1937_v58 = vpop.permute.xlu1 %1936 }
 0x5b2   :  { %v1939_v1 = vadd.f32 %v1937_v58, %v1929_v61 }
 0x5b4   :  { %v1945_v0 = vadd.f32 %v1944_v2, %v1939_v1  ;;  %v3523_v2 = vlaneseq }
 0x5b6   :  { %v1955_v49 = vadd.f32 %v1953_v9, %v1945_v0  ;;  %v1963_v48 = vpop.permute.xlu1 %1962  ;;  %v2232_v9 = vand.u32 127, %v3523_v2 }
 0x5b8   :  { %v1965_v17 = vadd.f32 %v1963_v48, %v1955_v49  ;;  %vm2266_vm8 = vcmp.eq.s32.totalorder %v2232_v9, 1  ;;  %vm2264_vm9 = vcmp.eq.s32.totalorder %v2232_v9, 0 }
 0x5bb   :  { %v1973_v23 = vpop.permute.xlu0 %1972 }
 0x5bc   :  { %v1975_v13 = vadd.f32 %v1973_v23, %v1965_v17 }
 0x5bf   :  { %v1984_v11 = vpop.permute.xlu0 %1983 }
 0x5c0   :  { %v1986_v25 = vadd.f32 %v1984_v11, %v1975_v13 }
 0x5c5   :  { %v2004_v53 = vpop.permute.xlu0 %2003 }
 0x5c7   :  { %v2019_v62 = vpop.permute.xlu1 %2018 }
 0x5c8   :  { %v2021_v12 = vmul.f32 %v2019_v62, %v3222_v63 }
 0x5ca   :  { %v2030_v18 = vpop.permute.xlu0 %2029 }
 0x5cb   :  { %v1994_v51 = vpop.permute.xlu1 %1993 }
 0x5cc   :  { %v1996_v42 = vadd.f32 %v1994_v51, %v1986_v25 }
 0x5ce   :  { %v2006_v34 = vadd.f32 %v2004_v53, %v1996_v42  ;;  %v2050_v14 = vpop.permute.xlu0 %2049 }
 0x5cf   :  { %v2014_v31 = vpop.permute.xlu1 %2013 }
 0x5d0   :  { %v2016_v7 = vadd.f32 %v2014_v31, %v2006_v34 }
 0x5d2   :  { %v2022_v15 = vadd.f32 %v2021_v12, %v2016_v7 }
 0x5d3   :  { %v2040_v6 = vpop.permute.xlu1 %2039 }
 0x5d4   :  { %v2032_v50 = vadd.f32 %v2030_v18, %v2022_v15  ;;  %v2061_v5 = vpop.permute.xlu0 %2060 }
 0x5d6   :  { %v2042_v44 = vadd.f32 %v2040_v6, %v2032_v50 }
 0x5d8   :  { %v2052_v3 = vadd.f32 %v2050_v14, %v2042_v44  ;;  %v2081_v33 = vpop.permute.xlu0 %2080 }
 0x5da   :  { %v2063_v47 = vadd.f32 %v2061_v5, %v2052_v3 }
 0x5e0   :  { %v2096_v29 = vpop.permute.xlu1 %2095 }
 0x5e1   :  { %v2098_v36 = vmul.f32 %v2096_v29, %v3217_v4 }
 0x5e3   :  { %v2107_v22 = vpop.permute.xlu0 %2106 }
 0x5e4   :  { %v2071_v26 = vpop.permute.xlu1 %2070 }
 0x5e5   :  { %v2073_v56 = vadd.f32 %v2071_v26, %v2063_v47 }
 0x5e7   :  { %v2083_v38 = vadd.f32 %v2081_v33, %v2073_v56 }
 0x5e8   :  { %v2091_v40 = vpop.permute.xlu1 %2090  ;;  %v2127_v63 = vpop.permute.xlu0 %2126 }
 0x5e9   :  { %v2093_v8 = vadd.f32 %v2091_v40, %v2083_v38 }
 0x5eb   :  { %v2099_v30 = vadd.f32 %v2098_v36, %v2093_v8 }
 0x5ec   :  { %v2117_v21 = vpop.permute.xlu1 %2116 }
 0x5ed   :  { %v2109_v27 = vadd.f32 %v2107_v22, %v2099_v30  ;;  %v2138_v28 = vpop.permute.xlu0 %2137 }
 0x5ef   :  { %v2119_v46 = vadd.f32 %v2117_v21, %v2109_v27 }
 0x5f1   :  { %v2129_v60 = vadd.f32 %v2127_v63, %v2119_v46 }
 0x5f2   :  { %v2158_v24 = vpop.permute.xlu0 %2157 }
 0x5f3   :  { %v2173_v32 = vpop.permute.xlu1 %2172  ;;  %v2140_v16 = vadd.f32 %v2138_v28, %v2129_v60 }
 0x5f4   :  { %v2175_v59 = vmul.f32 %v2173_v32, %v3224_v10 }
 0x5f6   :  { %v2184_v43 = vpop.permute.xlu0 %2183 }
 0x5f7   :  { %v2148_v20 = vpop.permute.xlu1 %2147 }
 0x5f8   :  { %v2150_v19 = vadd.f32 %v2148_v20, %v2140_v16 }
 0x5fa   :  { %v2160_v37 = vadd.f32 %v2158_v24, %v2150_v19 }
 0x5fb   :  { %v2168_v39 = vpop.permute.xlu1 %2167 }
 0x5fc   :  { %v2170_v41 = vadd.f32 %v2168_v39, %v2160_v37 }
 0x5fe   :  { %v2176_v4 = vadd.f32 %v2175_v59, %v2170_v41 }
 0x5ff   :  { %v2194_v52 = vpop.permute.xlu1 %2193 }
 0x600   :  { %v2186_v45 = vadd.f32 %v2184_v43, %v2176_v4 }
 0x601   :  { %v2204_v54 = vpop.permute.xlu0 %2203 }
 0x602   :  { %v2196_v55 = vadd.f32 %v2194_v52, %v2186_v45 }
 0x604   :  { %v2206_v57 = vadd.f32 %v2204_v54, %v2196_v55 }
 0x605   :  { %v2228_v35 = vpop.permute.xlu0 %2227 }
 0x606   :  { %v2230_v58 = vadd.f32 %v2228_v35, %v2206_v57  ;;  %v2208_v61 = vsel %vm2207_vm3, %v2206_v57, -inf }
 0x607   :  { %2209 = vmax.xlane.f32.xlu1 %v2208_v61 }
 0x608   :  { %v2233_v1 = vsel %vm2207_vm3, %v2230_v58, -inf }
 0x609   :  { %2234 = vmax.xlane.f32.xlu0 %v2233_v1 }
 0x618   :  { %2237 = vrot.lane.b32.xlu1 %v2232_v9, %s2788_s7 }
 0x694   :  { %v2210_v10 = vpop.xlane.xlu1 %2209 }
 0x695   :  { %v2211_v0 = vsub.f32 %v2206_v57, %v2210_v10 }
 0x696   :  { %v2235_v23 = vpop.xlane.xlu0 %2234 }
 0x697   :  { %v2212_v49 = vmul.f32 1.442695, %v2211_v0  ;;  %vm2236_vm4 = vcmp.eq.f32.partialorder %v2230_v58, %v2235_v23 }
 0x698   :  { %v2238_v48 = vpop.permute.xlu1 %2237 }
 0x699   :  { %2728 = vpow2.f32 %v2212_v49  ;;  %v2239_v17 = vsel %vm2236_vm4, %v2238_v48, 16 }
 0x69a   :  { %v2240_v11 = vsel %vm2207_vm3, %v2239_v17, 2147483647 }
 0x69b   :  { %v2242_v62 = vshra.s32 %v2240_v11, 16  ;;  %v2241_v42 = vand.u32 65535, %v2240_v11 }
 0x69d   :  { %v2244_v13 = vcvt.s32.f32 %v2242_v62  ;;  %v2243_v34 = vcvt.s32.f32 %v2241_v42 }
 0x69f   :  { %2245 = vmin.xlane.f32.xlu1 %v2244_v13 }
 0x6a3   :  { %v2729_v25 = vpop.eup %2728 }
 0x6a4   :  { %2215 = vrot.lane.b32.xlu0 %v2729_v25, %s2788_s7 }
 0x716   :  { %v2216_v53 = vpop.permute.xlu0 %2215 }
 0x717   :  { %v2219_v51 = vsel %vm2218_vm5, %v2216_v53, 0.0 }
 0x718   :  { %2220 = vadd.xlane.f32.xlu0 %v2219_v51 }
 0x72c   :  { %v2246_v31 = vpop.xlane.xlu1 %2245 }
 0x72d   :  { %vm2247_vm6 = vcmp.eq.f32.partialorder %v2244_v13, %v2246_v31  ;;  %v2252_v6 = vcvt.f32.s32 %v2246_v31 }
 0x72e   :  { %v2248_v7 = vsel %vm2247_vm6, %v2243_v34, inf }
 0x72f   :  { %2249 = vmin.xlane.f32.xlu1 %v2248_v7  ;;  %v2253_v5 = vshll.u32 %v2252_v6, 16 }
 0x7a5   :  { %v2221_v12 = vpop.xlane.xlu0 %2220 }
 0x7a6   :  { %2730 = vlog2.f32 %v2221_v12 }
 0x7b0   :  { %v2731_v18 = vpop.eup %2730 }
 0x7b1   :  { %v2223_v15 = vmul.f32 0.6931472, %v2731_v18 }
 0x7b3   :  { %v2224_v14 = vsub.f32 %v2211_v0, %v2223_v15 }
 0x7b5   :  { %2257 = vrot.lane.b32.xlu0 %v2224_v14, %s2788_s7 }
 0x7bc   :  { %v2250_v50 = vpop.xlane.xlu1 %2249 }
 0x7bd   :  { %v2251_v44 = vcvt.f32.s32 %v2250_v50 }
 0x7bf   :  { %v2254_v3 = vadd.s32 %v2253_v5, %v2251_v44 }
 0x7c1   :  { %vm2255_vm7 = vcmp.eq.s32.totalorder %v2232_v9, %v2254_v3  ;;  %v2265_v26 = vcvt.s32.f32 %v2254_v3 }
 0x827   :  { %v2258_v29 = vpop.permute.xlu0 %2257 }
 0x828   :  { %v2260_v33 = vsel %vm2255_vm7, %v2258_v29, 0.0 }
 0x829   :  { %v2261_v47 = vsel %vm2218_vm5, %v2260_v33, 0.0 }
 0x82a   :  { %2262 = vadd.xlane.f32.xlu1 %v2261_v47 }
 0x8b7   :  { %v2263_v22 = vpop.xlane.xlu1 %2262 }
 0x8b8   :  { %v2267_v56 = vsel %vm2266_vm8, %v2263_v22, 0.0 }
 0x8b9   :  { %v2268_v38 = vsel %vm2264_vm9, %v2265_v26, %v2267_v56 }
 0x8ba   :  { %2269 = vst [vmem:[%s3495_s9] sm:$0xff] %v2268_v38 }
 0x8bb   :  { %2274 = vsyncpa [#allocation4], 1 }

</bundles_post_ra>
